<compile_context>
chip_gen: v6e
topology: v6e:2x2x1
jax: 0.10.0
libtpu: 0.0.40
codegen_flags: <defaults>
</compile_context>

<pallas_src>
import functools

import jax
import jax.numpy as jnp
from jax.experimental import pallas as pl
from jax.experimental.pallas import tpu as pltpu


_VMEM_BUDGET_BYTES = 12 * 1024 * 1024  # stays under the 16 MiB v5e scoped default


def _round_up(x, m):
    return -(-x // m) * m


def _num_tensorcores():
    """Best-effort detection of TensorCores per device (megacore sharding)."""
    try:
        kind = jax.devices()[0].device_kind.lower()
    except Exception:
        return 1
    # Single-TC inference chips.
    if "lite" in kind or "v5e" in kind or "v6e" in kind or "v6" in kind:
        return 1
    # Dual-TC / megacore chips (v7x, v4, v5p).
    if "v7" in kind or "v4" in kind or "v5p" in kind:
        return 2
    return 1


def _pick_c_block(c, hw, itemsize, num_tc, budget=_VMEM_BUDGET_BYTES):
    """Largest multiple-of-8 channel block such that:
       * the grid has at least `num_tc` steps (shards across both TCs on v7x),
       * double-buffered (x + out) blocks plus the resident scale fit the
         VMEM budget, including lane padding of HW up to 128 in VMEM."""
    hw_pad = _round_up(max(hw, 1), 128)          # lane padding in VMEM
    scale_bytes = _round_up(max(c, 8), 8) * 128 * itemsize  # resident (C,1) buffer

    def vmem_bytes(blk):
        per_block = _round_up(blk, 8) * hw_pad * itemsize
        return 4 * per_block + scale_bytes       # x + out, each double-buffered

    blk = _round_up(max(1, -(-c // num_tc)), 8)  # ceil(C / num_tc), multiple of 8
    while blk > 8 and vmem_bytes(blk) > budget:
        blk = max(8, _round_up(blk // 2, 8))
    return blk


def _scale_mul_kernel(scale_ref, x_ref, o_ref, *, c_blk):
    # scale_ref: full (C_pad, 1) scale, resident in VMEM (constant index_map).
    # x_ref / o_ref: (c_blk, HW) tiles in VMEM.
    start = pl.multiple_of(pl.program_id(0) * c_blk, 8)
    s = scale_ref[pl.ds(start, c_blk), :]        # (c_blk, 1), sublane-aligned slice
    o_ref[...] = x_ref[...] * s                  # lane-broadcast VPU multiply


def broadcast_mul(x697, x692, *, donate_x=False):
    """x697: (1, C, 1, 1), x692: (1, C, H, W)  ->  (1, C, H, W)"""
    n, c, h, w = x692.shape
    assert n == 1 and x697.shape == (1, c, 1, 1)
    hw = h * w
    itemsize = jnp.dtype(x692.dtype).itemsize

    # Free, contiguous views of native NCHW (no transposes, no extra HBM passes).
    x2d = x692.reshape(c, hw)   # (C, HW)
    s2d = x697.reshape(c, 1)    # (C, 1)

    num_tc = _num_tensorcores()
    c_blk = _pick_c_block(c, hw, itemsize, num_tc)
    n_steps = pl.cdiv(c, c_blk)

    # Pad the (tiny) scale so the in-kernel dynamic slice never runs past the
    # resident buffer on a partial final block.  For the module's shape
    # (C=1824) this is a no-op.
    c_scale = n_steps * c_blk
    if c_scale != c:
        s2d = jnp.pad(s2d, ((0, c_scale - c), (0, 0)))

    kernel = functools.partial(_scale_mul_kernel, c_blk=c_blk)

    cost = pl.CostEstimate(
        flops=c * hw,
        transcendentals=0,
        bytes_accessed=2 * c * hw * itemsize + c * itemsize,
    )

    out2d = pl.pallas_call(
        kernel,
        out_shape=jax.ShapeDtypeStruct((c, hw), x692.dtype),
        grid=(n_steps,),
        in_specs=[
            # Whole scale, constant index_map -> one DMA, kept resident.
            pl.BlockSpec((c_scale, 1), lambda i: (0, 0)),
            pl.BlockSpec((c_blk, hw), lambda i: (i, 0)),
        ],
        out_specs=pl.BlockSpec((c_blk, hw), lambda i: (i, 0)),
        compiler_params=pltpu.CompilerParams(
            dimension_semantics=("parallel",)),
        cost_estimate=cost,
        input_output_aliases=({1: 0} if donate_x else {}),
    )(s2d, x2d)

    # Free reshape back to NCHW (same memory layout, no transpose).
    return out2d.reshape(1, c, h, w)


if __name__ == "__main__":
    key = jax.random.PRNGKey(0)
    k1, k2 = jax.random.split(key)

    # Shapes from the module's forward: x692: (1, 1824, 7, 7), x697: (1, 1824, 1, 1)
    C, H, W = 1824, 7, 7
    x692 = jax.random.normal(k1, (1, C, H, W), dtype=jnp.float32)
    x697 = jax.random.normal(k2, (1, C, 1, 1), dtype=jnp.float32)

    out = jax.block_until_ready(broadcast_mul(x697, x692))

    # Correctness check against plain-JAX broadcasting semantics.
    ref = x697 * x692
    assert out.shape == ref.shape == (1, C, H, W)
    assert out.dtype == ref.dtype
    assert jnp.allclose(out, ref, atol=1e-6, rtol=1e-6)

    print("KERNEL_OK")
</pallas_src>

<mosaic_0001>
module attributes {stable_mosaic.version = 11 : i64} {
  func.func @_scale_mul_kernel(%arg0: i32, %arg1: memref<1824x1xf32, #tpu.memory_space<vmem>>, %arg2: memref<1824x49xf32, #tpu.memory_space<vmem>>, %arg3: memref<1824x49xf32, #tpu.memory_space<vmem>>) attributes {dimension_semantics = [#tpu.dimension_semantics<parallel>], iteration_bounds = array<i64: 1>, scalar_prefetch = 0 : i64, scratch_operands = 0 : i64, tpu.core_type = #tpu.core_type<tc>, window_params = [{pipeline_mode = #tpu.pipeline_mode<synchronous>, transform_indices = @transform_0, window_bounds = array<i64: 1824, 1>}, {transform_indices = @transform_1, window_bounds = array<i64: 1824, 49>}, {transform_indices = @transform_2, window_bounds = array<i64: 1824, 49>}]} {
    %c1824_i32 = arith.constant 1824 : i32
    %0 = arith.muli %arg0, %c1824_i32 : i32
    %1 = tpu.assume_multiple %0, 8 : i32
    %2 = arith.index_cast %1 : i32 to index
    %c0 = arith.constant 0 : index
    %3 = vector.load %arg1[%2, %c0] : memref<1824x1xf32, #tpu.memory_space<vmem>>, vector<1824x1xf32>
    %c0_0 = arith.constant 0 : index
    %c0_1 = arith.constant 0 : index
    %4 = vector.load %arg2[%c0_0, %c0_1] : memref<1824x49xf32, #tpu.memory_space<vmem>>, vector<1824x49xf32>
    %5 = vector.broadcast %3 : vector<1824x1xf32> to vector<1824x49xf32>
    %6 = arith.mulf %4, %5 : vector<1824x49xf32>
    %c0_2 = arith.constant 0 : index
    %c0_3 = arith.constant 0 : index
    %7 = vector.load %arg3[%c0_2, %c0_3] : memref<1824x49xf32, #tpu.memory_space<vmem>>, vector<1824x49xf32>
    tpu.vector_store %arg3[%c0_2, %c0_3], %6 {strides = array<i32>} : memref<1824x49xf32, #tpu.memory_space<vmem>>, vector<1824x49xf32>,
    return
  }
  func.func @transform_0(%arg0: i32) -> (i32, i32) {
    %c0_i32 = arith.constant 0 : i32
    %c0_i32_0 = arith.constant 0 : i32
    %c0_i32_1 = arith.constant 0 : i32
    return %c0_i32, %c0_i32_0 : i32, i32
  }
  func.func @transform_1(%arg0: i32) -> (i32, i32) {
    %c0_i32 = arith.constant 0 : i32
    %c0_i32_0 = arith.constant 0 : i32
    return %arg0, %c0_i32 : i32, i32
  }
  func.func @transform_2(%arg0: i32) -> (i32, i32) {
    %c0_i32 = arith.constant 0 : i32
    %c0_i32_0 = arith.constant 0 : i32
    return %arg0, %c0_i32 : i32, i32
  }
}

</mosaic_0001>

<bundles_post_ra>
// kernel: tpu_custom_call.1
= control target key start
LH: loop header
LB: loop body
LE: loop exit
PB: predicated region body
PF: predicated region fallthrough
CT: control target
= control target key end

     0   :  { %v2073_v0 = vmov 0   ;;  %vm1837_vm0 = vcmask 400384   ;;  %s4369_s0 = inlined_call_operand.vmem [shape: f32[1824,1], index: 0, kind: input, shape index: {}]   ;;  %s4370_s1 = inlined_call_operand.vmem [shape: f32[1824,49], index: 1, kind: input, shape index: {}]   ;;  %s4371_s2 = inlined_call_operand.vmem [shape: f32[1824,49], index: 2, kind: output, shape index: {}]  }
   0x1   :  { %2072 = vset.pattern.permute.xlu1 %v2073_v0  ;;  %2071 = vset.pattern.permute.xlu0 %v2073_v0  ;;  %v15_v1 = vld [vmem:[%s4369_s0 + $0x10] sm:$0xff]  ;;  %v13_v2 = vld [vmem:[%s4369_s0] sm:$0xff]  ;;  %v16_v3 = vld [vmem:[%s4369_s0 + $0x18] sm:$0xff] }
   0x2   :  { %481 = vperm.xlu1 %2072, %v15_v1   ;;  %471 = vperm.xlu0 %2071, %v13_v2   ;;  %v14_v4 = vld [vmem:[%s4369_s0 + $0x8] sm:$0xff]  ;;  %v17_v6 = vld [vmem:[%s4369_s0 + $0x20] sm:$0xff]  ;;  %v20_v7 = vld [vmem:[%s4369_s0 + $0x38] sm:$0xff] }
   0x3   :  { %v18_v5 = vld [vmem:[%s4369_s0 + $0x28] sm:$0xff]  ;;  %v19_v8 = vld [vmem:[%s4369_s0 + $0x30] sm:$0xff]  ;;  %v21_v10 = vld [vmem:[%s4369_s0 + $0x40] sm:$0xff] }
   0x4   :  { %v22_v9 = vld [vmem:[%s4369_s0 + $0x48] sm:$0xff]  ;;  %v24_v11 = vld [vmem:[%s4369_s0 + $0x58] sm:$0xff]  ;;  %v23_v12 = vld [vmem:[%s4369_s0 + $0x50] sm:$0xff] }
   0x5   :  { %v26_v13 = vld [vmem:[%s4369_s0 + $0x68] sm:$0xff]  ;;  %v25_v14 = vld [vmem:[%s4369_s0 + $0x60] sm:$0xff]  ;;  %v28_v15 = vld [vmem:[%s4369_s0 + $0x78] sm:$0xff] }
   0x6   :  { %486 = vperm.xlu1 %2072, %v16_v3   ;;  %476 = vperm.xlu0 %2071, %v14_v4   ;;  %v27_v16 = vld [vmem:[%s4369_s0 + $0x70] sm:$0xff]  ;;  %v30_v17 = vld [vmem:[%s4369_s0 + $0x88] sm:$0xff]  ;;  %v29_v18 = vld [vmem:[%s4369_s0 + $0x80] sm:$0xff] }
   0x7   :  { %v32_v19 = vld [vmem:[%s4369_s0 + $0x98] sm:$0xff]  ;;  %v31_v20 = vld [vmem:[%s4369_s0 + $0x90] sm:$0xff]  ;;  %v34_v21 = vld [vmem:[%s4369_s0 + $0xa8] sm:$0xff] }
   0x8   :  { %v33_v22 = vld [vmem:[%s4369_s0 + $0xa0] sm:$0xff]  ;;  %v36_v23 = vld [vmem:[%s4369_s0 + $0xb8] sm:$0xff]  ;;  %v35_v24 = vld [vmem:[%s4369_s0 + $0xb0] sm:$0xff] }
   0x9   :  { %v38_v25 = vld [vmem:[%s4369_s0 + $0xc8] sm:$0xff]  ;;  %v37_v26 = vld [vmem:[%s4369_s0 + $0xc0] sm:$0xff]  ;;  %v40_v27 = vld [vmem:[%s4369_s0 + $0xd8] sm:$0xff] }
   0xa   :  { %496 = vperm.xlu1 %2072, %v18_v5   ;;  %491 = vperm.xlu0 %2071, %v17_v6   ;;  %v39_v28 = vld [vmem:[%s4369_s0 + $0xd0] sm:$0xff]  ;;  %v42_v29 = vld [vmem:[%s4369_s0 + $0xe8] sm:$0xff]  ;;  %v41_v30 = vld [vmem:[%s4369_s0 + $0xe0] sm:$0xff] }
   0xb   :  { %v44_v31 = vld [vmem:[%s4369_s0 + $0xf8] sm:$0xff]  ;;  %v43_v32 = vld [vmem:[%s4369_s0 + $0xf0] sm:$0xff]  ;;  %v46_v33 = vld [vmem:[%s4369_s0 + $0x108] sm:$0xff] }
   0xc   :  { %v45_v34 = vld [vmem:[%s4369_s0 + $0x100] sm:$0xff]  ;;  %v48_v35 = vld [vmem:[%s4369_s0 + $0x118] sm:$0xff]  ;;  %v47_v36 = vld [vmem:[%s4369_s0 + $0x110] sm:$0xff] }
   0xd   :  { %v50_v37 = vld [vmem:[%s4369_s0 + $0x128] sm:$0xff]  ;;  %v49_v38 = vld [vmem:[%s4369_s0 + $0x120] sm:$0xff]  ;;  %v52_v39 = vld [vmem:[%s4369_s0 + $0x138] sm:$0xff] }
   0xe   :  { %506 = vperm.xlu1 %2072, %v20_v7   ;;  %501 = vperm.xlu0 %2071, %v19_v8   ;;  %v51_v40 = vld [vmem:[%s4369_s0 + $0x130] sm:$0xff]  ;;  %v54_v41 = vld [vmem:[%s4369_s0 + $0x148] sm:$0xff]  ;;  %v53_v42 = vld [vmem:[%s4369_s0 + $0x140] sm:$0xff] }
   0xf   :  { %v56_v43 = vld [vmem:[%s4369_s0 + $0x158] sm:$0xff]  ;;  %v55_v44 = vld [vmem:[%s4369_s0 + $0x150] sm:$0xff]  ;;  %v58_v45 = vld [vmem:[%s4369_s0 + $0x168] sm:$0xff] }
  0x10   :  { %v57_v46 = vld [vmem:[%s4369_s0 + $0x160] sm:$0xff]  ;;  %v60_v47 = vld [vmem:[%s4369_s0 + $0x178] sm:$0xff]  ;;  %v59_v48 = vld [vmem:[%s4369_s0 + $0x170] sm:$0xff] }
  0x11   :  { %v62_v49 = vld [vmem:[%s4369_s0 + $0x188] sm:$0xff]  ;;  %v61_v50 = vld [vmem:[%s4369_s0 + $0x180] sm:$0xff]  ;;  %v64_v51 = vld [vmem:[%s4369_s0 + $0x198] sm:$0xff] }
  0x12   :  { %516 = vperm.xlu1 %2072, %v22_v9   ;;  %511 = vperm.xlu0 %2071, %v21_v10   ;;  %v63_v52 = vld [vmem:[%s4369_s0 + $0x190] sm:$0xff]  ;;  %v66_v53 = vld [vmem:[%s4369_s0 + $0x1a8] sm:$0xff]  ;;  %v65_v54 = vld [vmem:[%s4369_s0 + $0x1a0] sm:$0xff] }
  0x13   :  { %v68_v55 = vld [vmem:[%s4369_s0 + $0x1b8] sm:$0xff]  ;;  %v67_v56 = vld [vmem:[%s4369_s0 + $0x1b0] sm:$0xff]  ;;  %v70_v57 = vld [vmem:[%s4369_s0 + $0x1c8] sm:$0xff] }
  0x14   :  { %v69_v58 = vld [vmem:[%s4369_s0 + $0x1c0] sm:$0xff]  ;;  %v72_v59 = vld [vmem:[%s4369_s0 + $0x1d8] sm:$0xff]  ;;  %v71_v60 = vld [vmem:[%s4369_s0 + $0x1d0] sm:$0xff] }
  0x15   :  { %v74_v61 = vld [vmem:[%s4369_s0 + $0x1e8] sm:$0xff]  ;;  %v73_v62 = vld [vmem:[%s4369_s0 + $0x1e0] sm:$0xff]  ;;  %v243_v63 = vld [vmem:[%s4370_s1 + $0x10] sm:$0xff] }
  0x16   :  { %526 = vperm.xlu1 %2072, %v24_v11   ;;  %521 = vperm.xlu0 %2071, %v23_v12   ;;  %v241_v0 = vld [vmem:[%s4370_s1] sm:$0xff]  ;;  %v76_v1 = vld [vmem:[%s4369_s0 + $0x1f8] sm:$0xff]  ;;  %v75_v2 = vld [vmem:[%s4369_s0 + $0x1f0] sm:$0xff] }
  0x17   :  { %v244_v7 = vld [vmem:[%s4370_s1 + $0x18] sm:$0xff]  ;;  %v242_v8 = vld [vmem:[%s4370_s1 + $0x8] sm:$0xff]  ;;  %v77_v10 = vld [vmem:[%s4369_s0 + $0x200] sm:$0xff] }
  0x18   :  { %v78_v9 = vld [vmem:[%s4369_s0 + $0x208] sm:$0xff] }
  0x1a   :  { %536 = vperm.xlu1 %2072, %v26_v13   ;;  %531 = vperm.xlu0 %2071, %v25_v14  }
  0x1e   :  { %546 = vperm.xlu1 %2072, %v28_v15   ;;  %541 = vperm.xlu0 %2071, %v27_v16   ;;  %v246_v15 = vld [vmem:[%s4370_s1 + $0x28] sm:$0xff]  ;;  %v245_v16 = vld [vmem:[%s4370_s1 + $0x20] sm:$0xff] }
  0x22   :  { %556 = vperm.xlu1 %2072, %v30_v17   ;;  %551 = vperm.xlu0 %2071, %v29_v18   ;;  %v80_v17 = vld [vmem:[%s4369_s0 + $0x218] sm:$0xff]  ;;  %v79_v18 = vld [vmem:[%s4369_s0 + $0x210] sm:$0xff] }
  0x26   :  { %566 = vperm.xlu1 %2072, %v32_v19   ;;  %561 = vperm.xlu0 %2071, %v31_v20  }
  0x2a   :  { %576 = vperm.xlu1 %2072, %v34_v21   ;;  %571 = vperm.xlu0 %2071, %v33_v22  }
  0x2e   :  { %586 = vperm.xlu1 %2072, %v36_v23   ;;  %581 = vperm.xlu0 %2071, %v35_v24   ;;  %v248_v23 = vld [vmem:[%s4370_s1 + $0x38] sm:$0xff]  ;;  %v247_v24 = vld [vmem:[%s4370_s1 + $0x30] sm:$0xff] }
  0x32   :  { %596 = vperm.xlu1 %2072, %v38_v25   ;;  %591 = vperm.xlu0 %2071, %v37_v26   ;;  %v82_v25 = vld [vmem:[%s4369_s0 + $0x228] sm:$0xff]  ;;  %v81_v26 = vld [vmem:[%s4369_s0 + $0x220] sm:$0xff] }
  0x36   :  { %606 = vperm.xlu1 %2072, %v40_v27   ;;  %601 = vperm.xlu0 %2071, %v39_v28  }
  0x3a   :  { %616 = vperm.xlu1 %2072, %v42_v29   ;;  %611 = vperm.xlu0 %2071, %v41_v30  }
  0x3e   :  { %626 = vperm.xlu1 %2072, %v44_v31   ;;  %621 = vperm.xlu0 %2071, %v43_v32   ;;  %v250_v31 = vld [vmem:[%s4370_s1 + $0x48] sm:$0xff]  ;;  %v249_v32 = vld [vmem:[%s4370_s1 + $0x40] sm:$0xff] }
  0x42   :  { %636 = vperm.xlu1 %2072, %v46_v33   ;;  %631 = vperm.xlu0 %2071, %v45_v34   ;;  %v84_v33 = vld [vmem:[%s4369_s0 + $0x238] sm:$0xff]  ;;  %v83_v34 = vld [vmem:[%s4369_s0 + $0x230] sm:$0xff] }
  0x46   :  { %646 = vperm.xlu1 %2072, %v48_v35   ;;  %641 = vperm.xlu0 %2071, %v47_v36  }
  0x4a   :  { %656 = vperm.xlu1 %2072, %v50_v37   ;;  %651 = vperm.xlu0 %2071, %v49_v38  }
  0x4e   :  { %666 = vperm.xlu1 %2072, %v52_v39   ;;  %661 = vperm.xlu0 %2071, %v51_v40   ;;  %v252_v39 = vld [vmem:[%s4370_s1 + $0x58] sm:$0xff]  ;;  %v251_v40 = vld [vmem:[%s4370_s1 + $0x50] sm:$0xff] }
  0x52   :  { %676 = vperm.xlu1 %2072, %v54_v41   ;;  %671 = vperm.xlu0 %2071, %v53_v42   ;;  %v86_v41 = vld [vmem:[%s4369_s0 + $0x248] sm:$0xff]  ;;  %v85_v42 = vld [vmem:[%s4369_s0 + $0x240] sm:$0xff] }
  0x56   :  { %686 = vperm.xlu1 %2072, %v56_v43   ;;  %681 = vperm.xlu0 %2071, %v55_v44  }
  0x5a   :  { %696 = vperm.xlu1 %2072, %v58_v45   ;;  %691 = vperm.xlu0 %2071, %v57_v46  }
  0x5e   :  { %706 = vperm.xlu1 %2072, %v60_v47   ;;  %701 = vperm.xlu0 %2071, %v59_v48   ;;  %v254_v47 = vld [vmem:[%s4370_s1 + $0x68] sm:$0xff]  ;;  %v253_v48 = vld [vmem:[%s4370_s1 + $0x60] sm:$0xff] }
  0x62   :  { %716 = vperm.xlu1 %2072, %v62_v49   ;;  %711 = vperm.xlu0 %2071, %v61_v50   ;;  %v88_v49 = vld [vmem:[%s4369_s0 + $0x258] sm:$0xff]  ;;  %v87_v50 = vld [vmem:[%s4369_s0 + $0x250] sm:$0xff] }
  0x66   :  { %726 = vperm.xlu1 %2072, %v64_v51   ;;  %721 = vperm.xlu0 %2071, %v63_v52  }
  0x6a   :  { %736 = vperm.xlu1 %2072, %v66_v53   ;;  %731 = vperm.xlu0 %2071, %v65_v54  }
  0x6e   :  { %746 = vperm.xlu1 %2072, %v68_v55   ;;  %741 = vperm.xlu0 %2071, %v67_v56   ;;  %v256_v55 = vld [vmem:[%s4370_s1 + $0x78] sm:$0xff]  ;;  %v255_v56 = vld [vmem:[%s4370_s1 + $0x70] sm:$0xff] }
  0x72   :  { %756 = vperm.xlu1 %2072, %v70_v57   ;;  %751 = vperm.xlu0 %2071, %v69_v58   ;;  %v90_v57 = vld [vmem:[%s4369_s0 + $0x268] sm:$0xff]  ;;  %v89_v58 = vld [vmem:[%s4369_s0 + $0x260] sm:$0xff] }
  0x76   :  { %766 = vperm.xlu1 %2072, %v72_v59   ;;  %761 = vperm.xlu0 %2071, %v71_v60  }
  0x7a   :  { %776 = vperm.xlu1 %2072, %v74_v61   ;;  %771 = vperm.xlu0 %2071, %v73_v62  }
  0x7d   :  { %v482_v3 = vpop.permute.xlu1 %481  ;;  %v472_v4 = vpop.permute.xlu0 %471 }
  0x7e   :  { %v1611_v5 = vmul.f32 %v482_v3, %v243_v63  ;;  %v1609_v6 = vmul.f32 %v472_v4, %v241_v0  ;;  %786 = vperm.xlu1 %2072, %v76_v1   ;;  %781 = vperm.xlu0 %2071, %v75_v2   ;;  %v258_v63 = vld [vmem:[%s4370_s1 + $0x88] sm:$0xff]  ;;  %v257_v0 = vld [vmem:[%s4370_s1 + $0x80] sm:$0xff]  ;;  %v92_v1 = vld [vmem:[%s4369_s0 + $0x278] sm:$0xff] }
  0x7f   :  { %v91_v2 = vld [vmem:[%s4369_s0 + $0x270] sm:$0xff] }
  0x80   :  { %1840 = vst.msk [vmem:[%s4371_s2 + $0x10] sm:$0xff] %vm1837_vm0, %v1611_v5  ;;  %1838 = vst.msk [vmem:[%s4371_s2] sm:$0xff] %vm1837_vm0, %v1609_v6 }
  0x81   :  { %v487_v11 = vpop.permute.xlu1 %486  ;;  %v477_v12 = vpop.permute.xlu0 %476 }
  0x82   :  { %v1612_v13 = vmul.f32 %v487_v11, %v244_v7  ;;  %v1610_v14 = vmul.f32 %v477_v12, %v242_v8  ;;  %796 = vperm.xlu1 %2072, %v78_v9   ;;  %791 = vperm.xlu0 %2071, %v77_v10   ;;  %v260_v7 = vld [vmem:[%s4370_s1 + $0x98] sm:$0xff]  ;;  %v259_v8 = vld [vmem:[%s4370_s1 + $0x90] sm:$0xff]  ;;  %v94_v9 = vld [vmem:[%s4369_s0 + $0x288] sm:$0xff] }
  0x83   :  { %v93_v10 = vld [vmem:[%s4369_s0 + $0x280] sm:$0xff] }
  0x84   :  { %1841 = vst.msk [vmem:[%s4371_s2 + $0x18] sm:$0xff] %vm1837_vm0, %v1612_v13  ;;  %1839 = vst.msk [vmem:[%s4371_s2 + $0x8] sm:$0xff] %vm1837_vm0, %v1610_v14 }
  0x85   :  { %v497_v19 = vpop.permute.xlu1 %496  ;;  %v492_v20 = vpop.permute.xlu0 %491 }
  0x86   :  { %v1614_v21 = vmul.f32 %v497_v19, %v246_v15  ;;  %v1613_v22 = vmul.f32 %v492_v20, %v245_v16  ;;  %806 = vperm.xlu1 %2072, %v80_v17   ;;  %801 = vperm.xlu0 %2071, %v79_v18   ;;  %v262_v15 = vld [vmem:[%s4370_s1 + $0xa8] sm:$0xff]  ;;  %v261_v16 = vld [vmem:[%s4370_s1 + $0xa0] sm:$0xff]  ;;  %v96_v17 = vld [vmem:[%s4369_s0 + $0x298] sm:$0xff] }
  0x87   :  { %v95_v18 = vld [vmem:[%s4369_s0 + $0x290] sm:$0xff] }
  0x88   :  { %1843 = vst.msk [vmem:[%s4371_s2 + $0x28] sm:$0xff] %vm1837_vm0, %v1614_v21  ;;  %1842 = vst.msk [vmem:[%s4371_s2 + $0x20] sm:$0xff] %vm1837_vm0, %v1613_v22 }
  0x89   :  { %v507_v27 = vpop.permute.xlu1 %506  ;;  %v502_v28 = vpop.permute.xlu0 %501 }
  0x8a   :  { %v1616_v29 = vmul.f32 %v507_v27, %v248_v23  ;;  %v1615_v30 = vmul.f32 %v502_v28, %v247_v24  ;;  %816 = vperm.xlu1 %2072, %v82_v25   ;;  %811 = vperm.xlu0 %2071, %v81_v26   ;;  %v264_v23 = vld [vmem:[%s4370_s1 + $0xb8] sm:$0xff]  ;;  %v263_v24 = vld [vmem:[%s4370_s1 + $0xb0] sm:$0xff]  ;;  %v98_v25 = vld [vmem:[%s4369_s0 + $0x2a8] sm:$0xff] }
  0x8b   :  { %v97_v26 = vld [vmem:[%s4369_s0 + $0x2a0] sm:$0xff] }
  0x8c   :  { %1845 = vst.msk [vmem:[%s4371_s2 + $0x38] sm:$0xff] %vm1837_vm0, %v1616_v29  ;;  %1844 = vst.msk [vmem:[%s4371_s2 + $0x30] sm:$0xff] %vm1837_vm0, %v1615_v30 }
  0x8d   :  { %v517_v35 = vpop.permute.xlu1 %516  ;;  %v512_v36 = vpop.permute.xlu0 %511 }
  0x8e   :  { %v1618_v37 = vmul.f32 %v517_v35, %v250_v31  ;;  %v1617_v38 = vmul.f32 %v512_v36, %v249_v32  ;;  %826 = vperm.xlu1 %2072, %v84_v33   ;;  %821 = vperm.xlu0 %2071, %v83_v34   ;;  %v266_v31 = vld [vmem:[%s4370_s1 + $0xc8] sm:$0xff]  ;;  %v265_v32 = vld [vmem:[%s4370_s1 + $0xc0] sm:$0xff]  ;;  %v100_v33 = vld [vmem:[%s4369_s0 + $0x2b8] sm:$0xff] }
  0x8f   :  { %v99_v34 = vld [vmem:[%s4369_s0 + $0x2b0] sm:$0xff] }
  0x90   :  { %1847 = vst.msk [vmem:[%s4371_s2 + $0x48] sm:$0xff] %vm1837_vm0, %v1618_v37  ;;  %1846 = vst.msk [vmem:[%s4371_s2 + $0x40] sm:$0xff] %vm1837_vm0, %v1617_v38 }
  0x91   :  { %v527_v43 = vpop.permute.xlu1 %526  ;;  %v522_v44 = vpop.permute.xlu0 %521 }
  0x92   :  { %v1620_v45 = vmul.f32 %v527_v43, %v252_v39  ;;  %v1619_v46 = vmul.f32 %v522_v44, %v251_v40  ;;  %836 = vperm.xlu1 %2072, %v86_v41   ;;  %831 = vperm.xlu0 %2071, %v85_v42   ;;  %v268_v39 = vld [vmem:[%s4370_s1 + $0xd8] sm:$0xff]  ;;  %v267_v40 = vld [vmem:[%s4370_s1 + $0xd0] sm:$0xff]  ;;  %v102_v41 = vld [vmem:[%s4369_s0 + $0x2c8] sm:$0xff] }
  0x93   :  { %v101_v42 = vld [vmem:[%s4369_s0 + $0x2c0] sm:$0xff] }
  0x94   :  { %1849 = vst.msk [vmem:[%s4371_s2 + $0x58] sm:$0xff] %vm1837_vm0, %v1620_v45  ;;  %1848 = vst.msk [vmem:[%s4371_s2 + $0x50] sm:$0xff] %vm1837_vm0, %v1619_v46 }
  0x95   :  { %v537_v51 = vpop.permute.xlu1 %536  ;;  %v532_v52 = vpop.permute.xlu0 %531 }
  0x96   :  { %v1622_v53 = vmul.f32 %v537_v51, %v254_v47  ;;  %v1621_v54 = vmul.f32 %v532_v52, %v253_v48  ;;  %846 = vperm.xlu1 %2072, %v88_v49   ;;  %841 = vperm.xlu0 %2071, %v87_v50   ;;  %v270_v47 = vld [vmem:[%s4370_s1 + $0xe8] sm:$0xff]  ;;  %v269_v48 = vld [vmem:[%s4370_s1 + $0xe0] sm:$0xff]  ;;  %v104_v49 = vld [vmem:[%s4369_s0 + $0x2d8] sm:$0xff] }
  0x97   :  { %v103_v50 = vld [vmem:[%s4369_s0 + $0x2d0] sm:$0xff] }
  0x98   :  { %1851 = vst.msk [vmem:[%s4371_s2 + $0x68] sm:$0xff] %vm1837_vm0, %v1622_v53  ;;  %1850 = vst.msk [vmem:[%s4371_s2 + $0x60] sm:$0xff] %vm1837_vm0, %v1621_v54 }
  0x99   :  { %v547_v59 = vpop.permute.xlu1 %546  ;;  %v542_v60 = vpop.permute.xlu0 %541 }
  0x9a   :  { %v1624_v61 = vmul.f32 %v547_v59, %v256_v55  ;;  %v1623_v62 = vmul.f32 %v542_v60, %v255_v56  ;;  %856 = vperm.xlu1 %2072, %v90_v57   ;;  %851 = vperm.xlu0 %2071, %v89_v58   ;;  %v272_v55 = vld [vmem:[%s4370_s1 + $0xf8] sm:$0xff]  ;;  %v271_v56 = vld [vmem:[%s4370_s1 + $0xf0] sm:$0xff]  ;;  %v106_v57 = vld [vmem:[%s4369_s0 + $0x2e8] sm:$0xff] }
  0x9b   :  { %v105_v58 = vld [vmem:[%s4369_s0 + $0x2e0] sm:$0xff] }
  0x9c   :  { %1853 = vst.msk [vmem:[%s4371_s2 + $0x78] sm:$0xff] %vm1837_vm0, %v1624_v61  ;;  %1852 = vst.msk [vmem:[%s4371_s2 + $0x70] sm:$0xff] %vm1837_vm0, %v1623_v62 }
  0x9d   :  { %v557_v3 = vpop.permute.xlu1 %556  ;;  %v552_v4 = vpop.permute.xlu0 %551 }
  0x9e   :  { %v1626_v5 = vmul.f32 %v557_v3, %v258_v63  ;;  %v1625_v6 = vmul.f32 %v552_v4, %v257_v0  ;;  %866 = vperm.xlu1 %2072, %v92_v1   ;;  %861 = vperm.xlu0 %2071, %v91_v2   ;;  %v274_v63 = vld [vmem:[%s4370_s1 + $0x108] sm:$0xff]  ;;  %v273_v0 = vld [vmem:[%s4370_s1 + $0x100] sm:$0xff]  ;;  %v108_v1 = vld [vmem:[%s4369_s0 + $0x2f8] sm:$0xff] }
  0x9f   :  { %v107_v2 = vld [vmem:[%s4369_s0 + $0x2f0] sm:$0xff] }
  0xa0   :  { %1855 = vst.msk [vmem:[%s4371_s2 + $0x88] sm:$0xff] %vm1837_vm0, %v1626_v5  ;;  %1854 = vst.msk [vmem:[%s4371_s2 + $0x80] sm:$0xff] %vm1837_vm0, %v1625_v6 }
  0xa1   :  { %v567_v11 = vpop.permute.xlu1 %566  ;;  %v562_v12 = vpop.permute.xlu0 %561 }
  0xa2   :  { %v1628_v13 = vmul.f32 %v567_v11, %v260_v7  ;;  %v1627_v14 = vmul.f32 %v562_v12, %v259_v8  ;;  %876 = vperm.xlu1 %2072, %v94_v9   ;;  %871 = vperm.xlu0 %2071, %v93_v10   ;;  %v276_v7 = vld [vmem:[%s4370_s1 + $0x118] sm:$0xff]  ;;  %v275_v8 = vld [vmem:[%s4370_s1 + $0x110] sm:$0xff]  ;;  %v110_v9 = vld [vmem:[%s4369_s0 + $0x308] sm:$0xff] }
  0xa3   :  { %v109_v10 = vld [vmem:[%s4369_s0 + $0x300] sm:$0xff] }
  0xa4   :  { %1857 = vst.msk [vmem:[%s4371_s2 + $0x98] sm:$0xff] %vm1837_vm0, %v1628_v13  ;;  %1856 = vst.msk [vmem:[%s4371_s2 + $0x90] sm:$0xff] %vm1837_vm0, %v1627_v14 }
  0xa5   :  { %v577_v19 = vpop.permute.xlu1 %576  ;;  %v572_v20 = vpop.permute.xlu0 %571 }
  0xa6   :  { %v1630_v21 = vmul.f32 %v577_v19, %v262_v15  ;;  %v1629_v22 = vmul.f32 %v572_v20, %v261_v16  ;;  %886 = vperm.xlu1 %2072, %v96_v17   ;;  %881 = vperm.xlu0 %2071, %v95_v18   ;;  %v278_v15 = vld [vmem:[%s4370_s1 + $0x128] sm:$0xff]  ;;  %v277_v16 = vld [vmem:[%s4370_s1 + $0x120] sm:$0xff]  ;;  %v112_v17 = vld [vmem:[%s4369_s0 + $0x318] sm:$0xff] }
  0xa7   :  { %v111_v18 = vld [vmem:[%s4369_s0 + $0x310] sm:$0xff] }
  0xa8   :  { %1859 = vst.msk [vmem:[%s4371_s2 + $0xa8] sm:$0xff] %vm1837_vm0, %v1630_v21  ;;  %1858 = vst.msk [vmem:[%s4371_s2 + $0xa0] sm:$0xff] %vm1837_vm0, %v1629_v22 }
  0xa9   :  { %v587_v27 = vpop.permute.xlu1 %586  ;;  %v582_v28 = vpop.permute.xlu0 %581 }
  0xaa   :  { %v1632_v29 = vmul.f32 %v587_v27, %v264_v23  ;;  %v1631_v30 = vmul.f32 %v582_v28, %v263_v24  ;;  %896 = vperm.xlu1 %2072, %v98_v25   ;;  %891 = vperm.xlu0 %2071, %v97_v26   ;;  %v280_v23 = vld [vmem:[%s4370_s1 + $0x138] sm:$0xff]  ;;  %v279_v24 = vld [vmem:[%s4370_s1 + $0x130] sm:$0xff]  ;;  %v114_v25 = vld [vmem:[%s4369_s0 + $0x328] sm:$0xff] }
  0xab   :  { %v113_v26 = vld [vmem:[%s4369_s0 + $0x320] sm:$0xff] }
  0xac   :  { %1861 = vst.msk [vmem:[%s4371_s2 + $0xb8] sm:$0xff] %vm1837_vm0, %v1632_v29  ;;  %1860 = vst.msk [vmem:[%s4371_s2 + $0xb0] sm:$0xff] %vm1837_vm0, %v1631_v30 }
  0xad   :  { %v597_v35 = vpop.permute.xlu1 %596  ;;  %v592_v36 = vpop.permute.xlu0 %591 }
  0xae   :  { %v1634_v37 = vmul.f32 %v597_v35, %v266_v31  ;;  %v1633_v38 = vmul.f32 %v592_v36, %v265_v32  ;;  %906 = vperm.xlu1 %2072, %v100_v33   ;;  %901 = vperm.xlu0 %2071, %v99_v34   ;;  %v282_v31 = vld [vmem:[%s4370_s1 + $0x148] sm:$0xff]  ;;  %v281_v32 = vld [vmem:[%s4370_s1 + $0x140] sm:$0xff]  ;;  %v116_v33 = vld [vmem:[%s4369_s0 + $0x338] sm:$0xff] }
  0xaf   :  { %v115_v34 = vld [vmem:[%s4369_s0 + $0x330] sm:$0xff] }
  0xb0   :  { %1863 = vst.msk [vmem:[%s4371_s2 + $0xc8] sm:$0xff] %vm1837_vm0, %v1634_v37  ;;  %1862 = vst.msk [vmem:[%s4371_s2 + $0xc0] sm:$0xff] %vm1837_vm0, %v1633_v38 }
  0xb1   :  { %v607_v43 = vpop.permute.xlu1 %606  ;;  %v602_v44 = vpop.permute.xlu0 %601 }
  0xb2   :  { %v1636_v45 = vmul.f32 %v607_v43, %v268_v39  ;;  %v1635_v46 = vmul.f32 %v602_v44, %v267_v40  ;;  %916 = vperm.xlu1 %2072, %v102_v41   ;;  %911 = vperm.xlu0 %2071, %v101_v42   ;;  %v284_v39 = vld [vmem:[%s4370_s1 + $0x158] sm:$0xff]  ;;  %v283_v40 = vld [vmem:[%s4370_s1 + $0x150] sm:$0xff]  ;;  %v118_v41 = vld [vmem:[%s4369_s0 + $0x348] sm:$0xff] }
  0xb3   :  { %v117_v42 = vld [vmem:[%s4369_s0 + $0x340] sm:$0xff] }
  0xb4   :  { %1865 = vst.msk [vmem:[%s4371_s2 + $0xd8] sm:$0xff] %vm1837_vm0, %v1636_v45  ;;  %1864 = vst.msk [vmem:[%s4371_s2 + $0xd0] sm:$0xff] %vm1837_vm0, %v1635_v46 }
  0xb5   :  { %v617_v51 = vpop.permute.xlu1 %616  ;;  %v612_v52 = vpop.permute.xlu0 %611 }
  0xb6   :  { %v1638_v53 = vmul.f32 %v617_v51, %v270_v47  ;;  %v1637_v54 = vmul.f32 %v612_v52, %v269_v48  ;;  %926 = vperm.xlu1 %2072, %v104_v49   ;;  %921 = vperm.xlu0 %2071, %v103_v50   ;;  %v286_v47 = vld [vmem:[%s4370_s1 + $0x168] sm:$0xff]  ;;  %v285_v48 = vld [vmem:[%s4370_s1 + $0x160] sm:$0xff]  ;;  %v120_v49 = vld [vmem:[%s4369_s0 + $0x358] sm:$0xff] }
  0xb7   :  { %v119_v50 = vld [vmem:[%s4369_s0 + $0x350] sm:$0xff] }
  0xb8   :  { %1867 = vst.msk [vmem:[%s4371_s2 + $0xe8] sm:$0xff] %vm1837_vm0, %v1638_v53  ;;  %1866 = vst.msk [vmem:[%s4371_s2 + $0xe0] sm:$0xff] %vm1837_vm0, %v1637_v54 }
  0xb9   :  { %v627_v59 = vpop.permute.xlu1 %626  ;;  %v622_v60 = vpop.permute.xlu0 %621 }
  0xba   :  { %v1640_v61 = vmul.f32 %v627_v59, %v272_v55  ;;  %v1639_v62 = vmul.f32 %v622_v60, %v271_v56  ;;  %936 = vperm.xlu1 %2072, %v106_v57   ;;  %931 = vperm.xlu0 %2071, %v105_v58   ;;  %v288_v55 = vld [vmem:[%s4370_s1 + $0x178] sm:$0xff]  ;;  %v287_v56 = vld [vmem:[%s4370_s1 + $0x170] sm:$0xff]  ;;  %v122_v57 = vld [vmem:[%s4369_s0 + $0x368] sm:$0xff] }
  0xbb   :  { %v121_v58 = vld [vmem:[%s4369_s0 + $0x360] sm:$0xff] }
  0xbc   :  { %1869 = vst.msk [vmem:[%s4371_s2 + $0xf8] sm:$0xff] %vm1837_vm0, %v1640_v61  ;;  %1868 = vst.msk [vmem:[%s4371_s2 + $0xf0] sm:$0xff] %vm1837_vm0, %v1639_v62 }
  0xbd   :  { %v637_v3 = vpop.permute.xlu1 %636  ;;  %v632_v4 = vpop.permute.xlu0 %631 }
  0xbe   :  { %v1642_v5 = vmul.f32 %v637_v3, %v274_v63  ;;  %v1641_v6 = vmul.f32 %v632_v4, %v273_v0  ;;  %946 = vperm.xlu1 %2072, %v108_v1   ;;  %941 = vperm.xlu0 %2071, %v107_v2   ;;  %v290_v63 = vld [vmem:[%s4370_s1 + $0x188] sm:$0xff]  ;;  %v289_v0 = vld [vmem:[%s4370_s1 + $0x180] sm:$0xff]  ;;  %v124_v1 = vld [vmem:[%s4369_s0 + $0x378] sm:$0xff] }
  0xbf   :  { %v123_v2 = vld [vmem:[%s4369_s0 + $0x370] sm:$0xff] }
  0xc0   :  { %1871 = vst.msk [vmem:[%s4371_s2 + $0x108] sm:$0xff] %vm1837_vm0, %v1642_v5  ;;  %1870 = vst.msk [vmem:[%s4371_s2 + $0x100] sm:$0xff] %vm1837_vm0, %v1641_v6 }
  0xc1   :  { %v647_v11 = vpop.permute.xlu1 %646  ;;  %v642_v12 = vpop.permute.xlu0 %641 }
  0xc2   :  { %v1644_v13 = vmul.f32 %v647_v11, %v276_v7  ;;  %v1643_v14 = vmul.f32 %v642_v12, %v275_v8  ;;  %956 = vperm.xlu1 %2072, %v110_v9   ;;  %951 = vperm.xlu0 %2071, %v109_v10   ;;  %v292_v7 = vld [vmem:[%s4370_s1 + $0x198] sm:$0xff]  ;;  %v291_v8 = vld [vmem:[%s4370_s1 + $0x190] sm:$0xff]  ;;  %v126_v9 = vld [vmem:[%s4369_s0 + $0x388] sm:$0xff] }
  0xc3   :  { %v125_v10 = vld [vmem:[%s4369_s0 + $0x380] sm:$0xff] }
  0xc4   :  { %1873 = vst.msk [vmem:[%s4371_s2 + $0x118] sm:$0xff] %vm1837_vm0, %v1644_v13  ;;  %1872 = vst.msk [vmem:[%s4371_s2 + $0x110] sm:$0xff] %vm1837_vm0, %v1643_v14 }
  0xc5   :  { %v657_v19 = vpop.permute.xlu1 %656  ;;  %v652_v20 = vpop.permute.xlu0 %651 }
  0xc6   :  { %v1646_v21 = vmul.f32 %v657_v19, %v278_v15  ;;  %v1645_v22 = vmul.f32 %v652_v20, %v277_v16  ;;  %966 = vperm.xlu1 %2072, %v112_v17   ;;  %961 = vperm.xlu0 %2071, %v111_v18   ;;  %v294_v15 = vld [vmem:[%s4370_s1 + $0x1a8] sm:$0xff]  ;;  %v293_v16 = vld [vmem:[%s4370_s1 + $0x1a0] sm:$0xff]  ;;  %v128_v17 = vld [vmem:[%s4369_s0 + $0x398] sm:$0xff] }
  0xc7   :  { %v127_v18 = vld [vmem:[%s4369_s0 + $0x390] sm:$0xff] }
  0xc8   :  { %1875 = vst.msk [vmem:[%s4371_s2 + $0x128] sm:$0xff] %vm1837_vm0, %v1646_v21  ;;  %1874 = vst.msk [vmem:[%s4371_s2 + $0x120] sm:$0xff] %vm1837_vm0, %v1645_v22 }
  0xc9   :  { %v667_v27 = vpop.permute.xlu1 %666  ;;  %v662_v28 = vpop.permute.xlu0 %661 }
  0xca   :  { %v1648_v29 = vmul.f32 %v667_v27, %v280_v23  ;;  %v1647_v30 = vmul.f32 %v662_v28, %v279_v24  ;;  %976 = vperm.xlu1 %2072, %v114_v25   ;;  %971 = vperm.xlu0 %2071, %v113_v26   ;;  %v296_v23 = vld [vmem:[%s4370_s1 + $0x1b8] sm:$0xff]  ;;  %v295_v24 = vld [vmem:[%s4370_s1 + $0x1b0] sm:$0xff]  ;;  %v130_v25 = vld [vmem:[%s4369_s0 + $0x3a8] sm:$0xff] }
  0xcb   :  { %v129_v26 = vld [vmem:[%s4369_s0 + $0x3a0] sm:$0xff] }
  0xcc   :  { %1877 = vst.msk [vmem:[%s4371_s2 + $0x138] sm:$0xff] %vm1837_vm0, %v1648_v29  ;;  %1876 = vst.msk [vmem:[%s4371_s2 + $0x130] sm:$0xff] %vm1837_vm0, %v1647_v30 }
  0xcd   :  { %v677_v35 = vpop.permute.xlu1 %676  ;;  %v672_v36 = vpop.permute.xlu0 %671 }
  0xce   :  { %v1650_v37 = vmul.f32 %v677_v35, %v282_v31  ;;  %v1649_v38 = vmul.f32 %v672_v36, %v281_v32  ;;  %986 = vperm.xlu1 %2072, %v116_v33   ;;  %981 = vperm.xlu0 %2071, %v115_v34   ;;  %v298_v31 = vld [vmem:[%s4370_s1 + $0x1c8] sm:$0xff]  ;;  %v297_v32 = vld [vmem:[%s4370_s1 + $0x1c0] sm:$0xff]  ;;  %v132_v33 = vld [vmem:[%s4369_s0 + $0x3b8] sm:$0xff] }
  0xcf   :  { %v131_v34 = vld [vmem:[%s4369_s0 + $0x3b0] sm:$0xff] }
  0xd0   :  { %1879 = vst.msk [vmem:[%s4371_s2 + $0x148] sm:$0xff] %vm1837_vm0, %v1650_v37  ;;  %1878 = vst.msk [vmem:[%s4371_s2 + $0x140] sm:$0xff] %vm1837_vm0, %v1649_v38 }
  0xd1   :  { %v687_v43 = vpop.permute.xlu1 %686  ;;  %v682_v44 = vpop.permute.xlu0 %681 }
  0xd2   :  { %v1652_v45 = vmul.f32 %v687_v43, %v284_v39  ;;  %v1651_v46 = vmul.f32 %v682_v44, %v283_v40  ;;  %996 = vperm.xlu1 %2072, %v118_v41   ;;  %991 = vperm.xlu0 %2071, %v117_v42   ;;  %v300_v39 = vld [vmem:[%s4370_s1 + $0x1d8] sm:$0xff]  ;;  %v299_v40 = vld [vmem:[%s4370_s1 + $0x1d0] sm:$0xff]  ;;  %v134_v41 = vld [vmem:[%s4369_s0 + $0x3c8] sm:$0xff] }
  0xd3   :  { %v133_v42 = vld [vmem:[%s4369_s0 + $0x3c0] sm:$0xff] }
  0xd4   :  { %1881 = vst.msk [vmem:[%s4371_s2 + $0x158] sm:$0xff] %vm1837_vm0, %v1652_v45  ;;  %1880 = vst.msk [vmem:[%s4371_s2 + $0x150] sm:$0xff] %vm1837_vm0, %v1651_v46 }
  0xd5   :  { %v697_v51 = vpop.permute.xlu1 %696  ;;  %v692_v52 = vpop.permute.xlu0 %691 }
  0xd6   :  { %v1654_v53 = vmul.f32 %v697_v51, %v286_v47  ;;  %v1653_v54 = vmul.f32 %v692_v52, %v285_v48  ;;  %1006 = vperm.xlu1 %2072, %v120_v49   ;;  %1001 = vperm.xlu0 %2071, %v119_v50   ;;  %v302_v47 = vld [vmem:[%s4370_s1 + $0x1e8] sm:$0xff]  ;;  %v301_v48 = vld [vmem:[%s4370_s1 + $0x1e0] sm:$0xff]  ;;  %v136_v49 = vld [vmem:[%s4369_s0 + $0x3d8] sm:$0xff] }
  0xd7   :  { %v135_v50 = vld [vmem:[%s4369_s0 + $0x3d0] sm:$0xff] }
  0xd8   :  { %1883 = vst.msk [vmem:[%s4371_s2 + $0x168] sm:$0xff] %vm1837_vm0, %v1654_v53  ;;  %1882 = vst.msk [vmem:[%s4371_s2 + $0x160] sm:$0xff] %vm1837_vm0, %v1653_v54 }
  0xd9   :  { %v707_v59 = vpop.permute.xlu1 %706  ;;  %v702_v60 = vpop.permute.xlu0 %701 }
  0xda   :  { %v1656_v61 = vmul.f32 %v707_v59, %v288_v55  ;;  %v1655_v62 = vmul.f32 %v702_v60, %v287_v56  ;;  %1016 = vperm.xlu1 %2072, %v122_v57   ;;  %1011 = vperm.xlu0 %2071, %v121_v58   ;;  %v304_v55 = vld [vmem:[%s4370_s1 + $0x1f8] sm:$0xff]  ;;  %v303_v56 = vld [vmem:[%s4370_s1 + $0x1f0] sm:$0xff]  ;;  %v138_v57 = vld [vmem:[%s4369_s0 + $0x3e8] sm:$0xff] }
  0xdb   :  { %v137_v58 = vld [vmem:[%s4369_s0 + $0x3e0] sm:$0xff] }
  0xdc   :  { %1885 = vst.msk [vmem:[%s4371_s2 + $0x178] sm:$0xff] %vm1837_vm0, %v1656_v61  ;;  %1884 = vst.msk [vmem:[%s4371_s2 + $0x170] sm:$0xff] %vm1837_vm0, %v1655_v62 }
  0xdd   :  { %v717_v3 = vpop.permute.xlu1 %716  ;;  %v712_v4 = vpop.permute.xlu0 %711 }
  0xde   :  { %v1658_v5 = vmul.f32 %v717_v3, %v290_v63  ;;  %v1657_v6 = vmul.f32 %v712_v4, %v289_v0  ;;  %1026 = vperm.xlu1 %2072, %v124_v1   ;;  %1021 = vperm.xlu0 %2071, %v123_v2   ;;  %v306_v63 = vld [vmem:[%s4370_s1 + $0x208] sm:$0xff]  ;;  %v305_v0 = vld [vmem:[%s4370_s1 + $0x200] sm:$0xff]  ;;  %v140_v1 = vld [vmem:[%s4369_s0 + $0x3f8] sm:$0xff] }
  0xdf   :  { %v139_v2 = vld [vmem:[%s4369_s0 + $0x3f0] sm:$0xff] }
  0xe0   :  { %1887 = vst.msk [vmem:[%s4371_s2 + $0x188] sm:$0xff] %vm1837_vm0, %v1658_v5  ;;  %1886 = vst.msk [vmem:[%s4371_s2 + $0x180] sm:$0xff] %vm1837_vm0, %v1657_v6 }
  0xe1   :  { %v727_v11 = vpop.permute.xlu1 %726  ;;  %v722_v12 = vpop.permute.xlu0 %721 }
  0xe2   :  { %v1660_v13 = vmul.f32 %v727_v11, %v292_v7  ;;  %v1659_v14 = vmul.f32 %v722_v12, %v291_v8  ;;  %1036 = vperm.xlu1 %2072, %v126_v9   ;;  %1031 = vperm.xlu0 %2071, %v125_v10   ;;  %v308_v7 = vld [vmem:[%s4370_s1 + $0x218] sm:$0xff]  ;;  %v307_v8 = vld [vmem:[%s4370_s1 + $0x210] sm:$0xff]  ;;  %v142_v9 = vld [vmem:[%s4369_s0 + $0x408] sm:$0xff] }
  0xe3   :  { %v141_v10 = vld [vmem:[%s4369_s0 + $0x400] sm:$0xff] }
  0xe4   :  { %1889 = vst.msk [vmem:[%s4371_s2 + $0x198] sm:$0xff] %vm1837_vm0, %v1660_v13  ;;  %1888 = vst.msk [vmem:[%s4371_s2 + $0x190] sm:$0xff] %vm1837_vm0, %v1659_v14 }
  0xe5   :  { %v737_v19 = vpop.permute.xlu1 %736  ;;  %v732_v20 = vpop.permute.xlu0 %731 }
  0xe6   :  { %v1662_v21 = vmul.f32 %v737_v19, %v294_v15  ;;  %v1661_v22 = vmul.f32 %v732_v20, %v293_v16  ;;  %1046 = vperm.xlu1 %2072, %v128_v17   ;;  %1041 = vperm.xlu0 %2071, %v127_v18   ;;  %v310_v15 = vld [vmem:[%s4370_s1 + $0x228] sm:$0xff]  ;;  %v309_v16 = vld [vmem:[%s4370_s1 + $0x220] sm:$0xff]  ;;  %v144_v17 = vld [vmem:[%s4369_s0 + $0x418] sm:$0xff] }
  0xe7   :  { %v143_v18 = vld [vmem:[%s4369_s0 + $0x410] sm:$0xff] }
  0xe8   :  { %1891 = vst.msk [vmem:[%s4371_s2 + $0x1a8] sm:$0xff] %vm1837_vm0, %v1662_v21  ;;  %1890 = vst.msk [vmem:[%s4371_s2 + $0x1a0] sm:$0xff] %vm1837_vm0, %v1661_v22 }
  0xe9   :  { %v747_v27 = vpop.permute.xlu1 %746  ;;  %v742_v28 = vpop.permute.xlu0 %741 }
  0xea   :  { %v1664_v29 = vmul.f32 %v747_v27, %v296_v23  ;;  %v1663_v30 = vmul.f32 %v742_v28, %v295_v24  ;;  %1056 = vperm.xlu1 %2072, %v130_v25   ;;  %1051 = vperm.xlu0 %2071, %v129_v26   ;;  %v312_v23 = vld [vmem:[%s4370_s1 + $0x238] sm:$0xff]  ;;  %v311_v24 = vld [vmem:[%s4370_s1 + $0x230] sm:$0xff]  ;;  %v146_v25 = vld [vmem:[%s4369_s0 + $0x428] sm:$0xff] }
  0xeb   :  { %v145_v26 = vld [vmem:[%s4369_s0 + $0x420] sm:$0xff] }
  0xec   :  { %1893 = vst.msk [vmem:[%s4371_s2 + $0x1b8] sm:$0xff] %vm1837_vm0, %v1664_v29  ;;  %1892 = vst.msk [vmem:[%s4371_s2 + $0x1b0] sm:$0xff] %vm1837_vm0, %v1663_v30 }
  0xed   :  { %v757_v35 = vpop.permute.xlu1 %756  ;;  %v752_v36 = vpop.permute.xlu0 %751 }
  0xee   :  { %v1666_v37 = vmul.f32 %v757_v35, %v298_v31  ;;  %v1665_v38 = vmul.f32 %v752_v36, %v297_v32  ;;  %1066 = vperm.xlu1 %2072, %v132_v33   ;;  %1061 = vperm.xlu0 %2071, %v131_v34   ;;  %v314_v31 = vld [vmem:[%s4370_s1 + $0x248] sm:$0xff]  ;;  %v313_v32 = vld [vmem:[%s4370_s1 + $0x240] sm:$0xff]  ;;  %v148_v33 = vld [vmem:[%s4369_s0 + $0x438] sm:$0xff] }
  0xef   :  { %v147_v34 = vld [vmem:[%s4369_s0 + $0x430] sm:$0xff] }
  0xf0   :  { %1895 = vst.msk [vmem:[%s4371_s2 + $0x1c8] sm:$0xff] %vm1837_vm0, %v1666_v37  ;;  %1894 = vst.msk [vmem:[%s4371_s2 + $0x1c0] sm:$0xff] %vm1837_vm0, %v1665_v38 }
  0xf1   :  { %v767_v43 = vpop.permute.xlu1 %766  ;;  %v762_v44 = vpop.permute.xlu0 %761 }
  0xf2   :  { %v1668_v45 = vmul.f32 %v767_v43, %v300_v39  ;;  %v1667_v46 = vmul.f32 %v762_v44, %v299_v40  ;;  %1076 = vperm.xlu1 %2072, %v134_v41   ;;  %1071 = vperm.xlu0 %2071, %v133_v42   ;;  %v316_v39 = vld [vmem:[%s4370_s1 + $0x258] sm:$0xff]  ;;  %v315_v40 = vld [vmem:[%s4370_s1 + $0x250] sm:$0xff]  ;;  %v150_v41 = vld [vmem:[%s4369_s0 + $0x448] sm:$0xff] }
  0xf3   :  { %v149_v42 = vld [vmem:[%s4369_s0 + $0x440] sm:$0xff] }
  0xf4   :  { %1897 = vst.msk [vmem:[%s4371_s2 + $0x1d8] sm:$0xff] %vm1837_vm0, %v1668_v45  ;;  %1896 = vst.msk [vmem:[%s4371_s2 + $0x1d0] sm:$0xff] %vm1837_vm0, %v1667_v46 }
  0xf5   :  { %v777_v51 = vpop.permute.xlu1 %776  ;;  %v772_v52 = vpop.permute.xlu0 %771 }
  0xf6   :  { %v1670_v53 = vmul.f32 %v777_v51, %v302_v47  ;;  %v1669_v54 = vmul.f32 %v772_v52, %v301_v48  ;;  %1086 = vperm.xlu1 %2072, %v136_v49   ;;  %1081 = vperm.xlu0 %2071, %v135_v50   ;;  %v318_v47 = vld [vmem:[%s4370_s1 + $0x268] sm:$0xff]  ;;  %v317_v48 = vld [vmem:[%s4370_s1 + $0x260] sm:$0xff]  ;;  %v152_v49 = vld [vmem:[%s4369_s0 + $0x458] sm:$0xff] }
  0xf7   :  { %v151_v50 = vld [vmem:[%s4369_s0 + $0x450] sm:$0xff] }
  0xf8   :  { %1899 = vst.msk [vmem:[%s4371_s2 + $0x1e8] sm:$0xff] %vm1837_vm0, %v1670_v53  ;;  %1898 = vst.msk [vmem:[%s4371_s2 + $0x1e0] sm:$0xff] %vm1837_vm0, %v1669_v54 }
  0xf9   :  { %v787_v59 = vpop.permute.xlu1 %786  ;;  %v782_v60 = vpop.permute.xlu0 %781 }
  0xfa   :  { %v1672_v61 = vmul.f32 %v787_v59, %v304_v55  ;;  %v1671_v62 = vmul.f32 %v782_v60, %v303_v56  ;;  %1096 = vperm.xlu1 %2072, %v138_v57   ;;  %1091 = vperm.xlu0 %2071, %v137_v58   ;;  %v320_v55 = vld [vmem:[%s4370_s1 + $0x278] sm:$0xff]  ;;  %v319_v56 = vld [vmem:[%s4370_s1 + $0x270] sm:$0xff]  ;;  %v154_v57 = vld [vmem:[%s4369_s0 + $0x468] sm:$0xff] }
  0xfb   :  { %v153_v58 = vld [vmem:[%s4369_s0 + $0x460] sm:$0xff] }
  0xfc   :  { %1901 = vst.msk [vmem:[%s4371_s2 + $0x1f8] sm:$0xff] %vm1837_vm0, %v1672_v61  ;;  %1900 = vst.msk [vmem:[%s4371_s2 + $0x1f0] sm:$0xff] %vm1837_vm0, %v1671_v62 }
  0xfd   :  { %v797_v3 = vpop.permute.xlu1 %796  ;;  %v792_v4 = vpop.permute.xlu0 %791 }
  0xfe   :  { %v1674_v5 = vmul.f32 %v797_v3, %v306_v63  ;;  %v1673_v6 = vmul.f32 %v792_v4, %v305_v0  ;;  %1106 = vperm.xlu1 %2072, %v140_v1   ;;  %1101 = vperm.xlu0 %2071, %v139_v2   ;;  %v322_v63 = vld [vmem:[%s4370_s1 + $0x288] sm:$0xff]  ;;  %v321_v0 = vld [vmem:[%s4370_s1 + $0x280] sm:$0xff]  ;;  %v156_v1 = vld [vmem:[%s4369_s0 + $0x478] sm:$0xff] }
  0xff   :  { %v155_v2 = vld [vmem:[%s4369_s0 + $0x470] sm:$0xff] }
 0x100   :  { %1903 = vst.msk [vmem:[%s4371_s2 + $0x208] sm:$0xff] %vm1837_vm0, %v1674_v5  ;;  %1902 = vst.msk [vmem:[%s4371_s2 + $0x200] sm:$0xff] %vm1837_vm0, %v1673_v6 }
 0x101   :  { %v807_v11 = vpop.permute.xlu1 %806  ;;  %v802_v12 = vpop.permute.xlu0 %801 }
 0x102   :  { %v1676_v13 = vmul.f32 %v807_v11, %v308_v7  ;;  %v1675_v14 = vmul.f32 %v802_v12, %v307_v8  ;;  %1116 = vperm.xlu1 %2072, %v142_v9   ;;  %1111 = vperm.xlu0 %2071, %v141_v10   ;;  %v324_v7 = vld [vmem:[%s4370_s1 + $0x298] sm:$0xff]  ;;  %v323_v8 = vld [vmem:[%s4370_s1 + $0x290] sm:$0xff]  ;;  %v158_v9 = vld [vmem:[%s4369_s0 + $0x488] sm:$0xff] }
 0x103   :  { %v157_v10 = vld [vmem:[%s4369_s0 + $0x480] sm:$0xff] }
 0x104   :  { %1905 = vst.msk [vmem:[%s4371_s2 + $0x218] sm:$0xff] %vm1837_vm0, %v1676_v13  ;;  %1904 = vst.msk [vmem:[%s4371_s2 + $0x210] sm:$0xff] %vm1837_vm0, %v1675_v14 }
 0x105   :  { %v817_v19 = vpop.permute.xlu1 %816  ;;  %v812_v20 = vpop.permute.xlu0 %811 }
 0x106   :  { %v1678_v21 = vmul.f32 %v817_v19, %v310_v15  ;;  %v1677_v22 = vmul.f32 %v812_v20, %v309_v16  ;;  %1126 = vperm.xlu1 %2072, %v144_v17   ;;  %1121 = vperm.xlu0 %2071, %v143_v18   ;;  %v326_v15 = vld [vmem:[%s4370_s1 + $0x2a8] sm:$0xff]  ;;  %v325_v16 = vld [vmem:[%s4370_s1 + $0x2a0] sm:$0xff]  ;;  %v160_v17 = vld [vmem:[%s4369_s0 + $0x498] sm:$0xff] }
 0x107   :  { %v159_v18 = vld [vmem:[%s4369_s0 + $0x490] sm:$0xff] }
 0x108   :  { %1907 = vst.msk [vmem:[%s4371_s2 + $0x228] sm:$0xff] %vm1837_vm0, %v1678_v21  ;;  %1906 = vst.msk [vmem:[%s4371_s2 + $0x220] sm:$0xff] %vm1837_vm0, %v1677_v22 }
 0x109   :  { %v827_v27 = vpop.permute.xlu1 %826  ;;  %v822_v28 = vpop.permute.xlu0 %821 }
 0x10a   :  { %v1680_v29 = vmul.f32 %v827_v27, %v312_v23  ;;  %v1679_v30 = vmul.f32 %v822_v28, %v311_v24  ;;  %1136 = vperm.xlu1 %2072, %v146_v25   ;;  %1131 = vperm.xlu0 %2071, %v145_v26   ;;  %v328_v23 = vld [vmem:[%s4370_s1 + $0x2b8] sm:$0xff]  ;;  %v327_v24 = vld [vmem:[%s4370_s1 + $0x2b0] sm:$0xff]  ;;  %v162_v25 = vld [vmem:[%s4369_s0 + $0x4a8] sm:$0xff] }
 0x10b   :  { %v161_v26 = vld [vmem:[%s4369_s0 + $0x4a0] sm:$0xff] }
 0x10c   :  { %1909 = vst.msk [vmem:[%s4371_s2 + $0x238] sm:$0xff] %vm1837_vm0, %v1680_v29  ;;  %1908 = vst.msk [vmem:[%s4371_s2 + $0x230] sm:$0xff] %vm1837_vm0, %v1679_v30 }
 0x10d   :  { %v837_v35 = vpop.permute.xlu1 %836  ;;  %v832_v36 = vpop.permute.xlu0 %831 }
 0x10e   :  { %v1682_v37 = vmul.f32 %v837_v35, %v314_v31  ;;  %v1681_v38 = vmul.f32 %v832_v36, %v313_v32  ;;  %1146 = vperm.xlu1 %2072, %v148_v33   ;;  %1141 = vperm.xlu0 %2071, %v147_v34   ;;  %v330_v31 = vld [vmem:[%s4370_s1 + $0x2c8] sm:$0xff]  ;;  %v329_v32 = vld [vmem:[%s4370_s1 + $0x2c0] sm:$0xff]  ;;  %v164_v33 = vld [vmem:[%s4369_s0 + $0x4b8] sm:$0xff] }
 0x10f   :  { %v163_v34 = vld [vmem:[%s4369_s0 + $0x4b0] sm:$0xff] }
 0x110   :  { %1911 = vst.msk [vmem:[%s4371_s2 + $0x248] sm:$0xff] %vm1837_vm0, %v1682_v37  ;;  %1910 = vst.msk [vmem:[%s4371_s2 + $0x240] sm:$0xff] %vm1837_vm0, %v1681_v38 }
 0x111   :  { %v847_v43 = vpop.permute.xlu1 %846  ;;  %v842_v44 = vpop.permute.xlu0 %841 }
 0x112   :  { %v1684_v45 = vmul.f32 %v847_v43, %v316_v39  ;;  %v1683_v46 = vmul.f32 %v842_v44, %v315_v40  ;;  %1156 = vperm.xlu1 %2072, %v150_v41   ;;  %1151 = vperm.xlu0 %2071, %v149_v42   ;;  %v332_v39 = vld [vmem:[%s4370_s1 + $0x2d8] sm:$0xff]  ;;  %v331_v40 = vld [vmem:[%s4370_s1 + $0x2d0] sm:$0xff]  ;;  %v166_v41 = vld [vmem:[%s4369_s0 + $0x4c8] sm:$0xff] }
 0x113   :  { %v165_v42 = vld [vmem:[%s4369_s0 + $0x4c0] sm:$0xff] }
 0x114   :  { %1913 = vst.msk [vmem:[%s4371_s2 + $0x258] sm:$0xff] %vm1837_vm0, %v1684_v45  ;;  %1912 = vst.msk [vmem:[%s4371_s2 + $0x250] sm:$0xff] %vm1837_vm0, %v1683_v46 }
 0x115   :  { %v857_v51 = vpop.permute.xlu1 %856  ;;  %v852_v52 = vpop.permute.xlu0 %851 }
 0x116   :  { %v1686_v53 = vmul.f32 %v857_v51, %v318_v47  ;;  %v1685_v54 = vmul.f32 %v852_v52, %v317_v48  ;;  %1166 = vperm.xlu1 %2072, %v152_v49   ;;  %1161 = vperm.xlu0 %2071, %v151_v50   ;;  %v334_v47 = vld [vmem:[%s4370_s1 + $0x2e8] sm:$0xff]  ;;  %v333_v48 = vld [vmem:[%s4370_s1 + $0x2e0] sm:$0xff]  ;;  %v168_v49 = vld [vmem:[%s4369_s0 + $0x4d8] sm:$0xff] }
 0x117   :  { %v167_v50 = vld [vmem:[%s4369_s0 + $0x4d0] sm:$0xff] }
 0x118   :  { %1915 = vst.msk [vmem:[%s4371_s2 + $0x268] sm:$0xff] %vm1837_vm0, %v1686_v53  ;;  %1914 = vst.msk [vmem:[%s4371_s2 + $0x260] sm:$0xff] %vm1837_vm0, %v1685_v54 }
 0x119   :  { %v867_v59 = vpop.permute.xlu1 %866  ;;  %v862_v60 = vpop.permute.xlu0 %861 }
 0x11a   :  { %v1688_v61 = vmul.f32 %v867_v59, %v320_v55  ;;  %v1687_v62 = vmul.f32 %v862_v60, %v319_v56  ;;  %1176 = vperm.xlu1 %2072, %v154_v57   ;;  %1171 = vperm.xlu0 %2071, %v153_v58   ;;  %v336_v55 = vld [vmem:[%s4370_s1 + $0x2f8] sm:$0xff]  ;;  %v335_v56 = vld [vmem:[%s4370_s1 + $0x2f0] sm:$0xff]  ;;  %v170_v57 = vld [vmem:[%s4369_s0 + $0x4e8] sm:$0xff] }
 0x11b   :  { %v169_v58 = vld [vmem:[%s4369_s0 + $0x4e0] sm:$0xff] }
 0x11c   :  { %1917 = vst.msk [vmem:[%s4371_s2 + $0x278] sm:$0xff] %vm1837_vm0, %v1688_v61  ;;  %1916 = vst.msk [vmem:[%s4371_s2 + $0x270] sm:$0xff] %vm1837_vm0, %v1687_v62 }
 0x11d   :  { %v877_v3 = vpop.permute.xlu1 %876  ;;  %v872_v4 = vpop.permute.xlu0 %871 }
 0x11e   :  { %v1690_v5 = vmul.f32 %v877_v3, %v322_v63  ;;  %v1689_v6 = vmul.f32 %v872_v4, %v321_v0  ;;  %1186 = vperm.xlu1 %2072, %v156_v1   ;;  %1181 = vperm.xlu0 %2071, %v155_v2   ;;  %v338_v63 = vld [vmem:[%s4370_s1 + $0x308] sm:$0xff]  ;;  %v337_v0 = vld [vmem:[%s4370_s1 + $0x300] sm:$0xff]  ;;  %v172_v1 = vld [vmem:[%s4369_s0 + $0x4f8] sm:$0xff] }
 0x11f   :  { %v171_v2 = vld [vmem:[%s4369_s0 + $0x4f0] sm:$0xff] }
 0x120   :  { %1919 = vst.msk [vmem:[%s4371_s2 + $0x288] sm:$0xff] %vm1837_vm0, %v1690_v5  ;;  %1918 = vst.msk [vmem:[%s4371_s2 + $0x280] sm:$0xff] %vm1837_vm0, %v1689_v6 }
 0x121   :  { %v887_v11 = vpop.permute.xlu1 %886  ;;  %v882_v12 = vpop.permute.xlu0 %881 }
 0x122   :  { %v1692_v13 = vmul.f32 %v887_v11, %v324_v7  ;;  %v1691_v14 = vmul.f32 %v882_v12, %v323_v8  ;;  %1196 = vperm.xlu1 %2072, %v158_v9   ;;  %1191 = vperm.xlu0 %2071, %v157_v10   ;;  %v340_v7 = vld [vmem:[%s4370_s1 + $0x318] sm:$0xff]  ;;  %v339_v8 = vld [vmem:[%s4370_s1 + $0x310] sm:$0xff]  ;;  %v174_v9 = vld [vmem:[%s4369_s0 + $0x508] sm:$0xff] }
 0x123   :  { %v173_v10 = vld [vmem:[%s4369_s0 + $0x500] sm:$0xff] }
 0x124   :  { %1921 = vst.msk [vmem:[%s4371_s2 + $0x298] sm:$0xff] %vm1837_vm0, %v1692_v13  ;;  %1920 = vst.msk [vmem:[%s4371_s2 + $0x290] sm:$0xff] %vm1837_vm0, %v1691_v14 }
 0x125   :  { %v897_v19 = vpop.permute.xlu1 %896  ;;  %v892_v20 = vpop.permute.xlu0 %891 }
 0x126   :  { %v1694_v21 = vmul.f32 %v897_v19, %v326_v15  ;;  %v1693_v22 = vmul.f32 %v892_v20, %v325_v16  ;;  %1206 = vperm.xlu1 %2072, %v160_v17   ;;  %1201 = vperm.xlu0 %2071, %v159_v18   ;;  %v342_v15 = vld [vmem:[%s4370_s1 + $0x328] sm:$0xff]  ;;  %v341_v16 = vld [vmem:[%s4370_s1 + $0x320] sm:$0xff]  ;;  %v176_v17 = vld [vmem:[%s4369_s0 + $0x518] sm:$0xff] }
 0x127   :  { %v175_v18 = vld [vmem:[%s4369_s0 + $0x510] sm:$0xff] }
 0x128   :  { %1923 = vst.msk [vmem:[%s4371_s2 + $0x2a8] sm:$0xff] %vm1837_vm0, %v1694_v21  ;;  %1922 = vst.msk [vmem:[%s4371_s2 + $0x2a0] sm:$0xff] %vm1837_vm0, %v1693_v22 }
 0x129   :  { %v907_v27 = vpop.permute.xlu1 %906  ;;  %v902_v28 = vpop.permute.xlu0 %901 }
 0x12a   :  { %v1696_v29 = vmul.f32 %v907_v27, %v328_v23  ;;  %v1695_v30 = vmul.f32 %v902_v28, %v327_v24  ;;  %1216 = vperm.xlu1 %2072, %v162_v25   ;;  %1211 = vperm.xlu0 %2071, %v161_v26   ;;  %v344_v23 = vld [vmem:[%s4370_s1 + $0x338] sm:$0xff]  ;;  %v343_v24 = vld [vmem:[%s4370_s1 + $0x330] sm:$0xff]  ;;  %v178_v25 = vld [vmem:[%s4369_s0 + $0x528] sm:$0xff] }
 0x12b   :  { %v177_v26 = vld [vmem:[%s4369_s0 + $0x520] sm:$0xff] }
 0x12c   :  { %1925 = vst.msk [vmem:[%s4371_s2 + $0x2b8] sm:$0xff] %vm1837_vm0, %v1696_v29  ;;  %1924 = vst.msk [vmem:[%s4371_s2 + $0x2b0] sm:$0xff] %vm1837_vm0, %v1695_v30 }
 0x12d   :  { %v917_v35 = vpop.permute.xlu1 %916  ;;  %v912_v36 = vpop.permute.xlu0 %911 }
 0x12e   :  { %v1698_v37 = vmul.f32 %v917_v35, %v330_v31  ;;  %v1697_v38 = vmul.f32 %v912_v36, %v329_v32  ;;  %1226 = vperm.xlu1 %2072, %v164_v33   ;;  %1221 = vperm.xlu0 %2071, %v163_v34   ;;  %v346_v31 = vld [vmem:[%s4370_s1 + $0x348] sm:$0xff]  ;;  %v345_v32 = vld [vmem:[%s4370_s1 + $0x340] sm:$0xff]  ;;  %v180_v33 = vld [vmem:[%s4369_s0 + $0x538] sm:$0xff] }
 0x12f   :  { %v179_v34 = vld [vmem:[%s4369_s0 + $0x530] sm:$0xff] }
 0x130   :  { %1927 = vst.msk [vmem:[%s4371_s2 + $0x2c8] sm:$0xff] %vm1837_vm0, %v1698_v37  ;;  %1926 = vst.msk [vmem:[%s4371_s2 + $0x2c0] sm:$0xff] %vm1837_vm0, %v1697_v38 }
 0x131   :  { %v927_v43 = vpop.permute.xlu1 %926  ;;  %v922_v44 = vpop.permute.xlu0 %921 }
 0x132   :  { %v1700_v45 = vmul.f32 %v927_v43, %v332_v39  ;;  %v1699_v46 = vmul.f32 %v922_v44, %v331_v40  ;;  %1236 = vperm.xlu1 %2072, %v166_v41   ;;  %1231 = vperm.xlu0 %2071, %v165_v42   ;;  %v348_v39 = vld [vmem:[%s4370_s1 + $0x358] sm:$0xff]  ;;  %v347_v40 = vld [vmem:[%s4370_s1 + $0x350] sm:$0xff]  ;;  %v182_v41 = vld [vmem:[%s4369_s0 + $0x548] sm:$0xff] }
 0x133   :  { %v181_v42 = vld [vmem:[%s4369_s0 + $0x540] sm:$0xff] }
 0x134   :  { %1929 = vst.msk [vmem:[%s4371_s2 + $0x2d8] sm:$0xff] %vm1837_vm0, %v1700_v45  ;;  %1928 = vst.msk [vmem:[%s4371_s2 + $0x2d0] sm:$0xff] %vm1837_vm0, %v1699_v46 }
 0x135   :  { %v937_v51 = vpop.permute.xlu1 %936  ;;  %v932_v52 = vpop.permute.xlu0 %931 }
 0x136   :  { %v1702_v53 = vmul.f32 %v937_v51, %v334_v47  ;;  %v1701_v54 = vmul.f32 %v932_v52, %v333_v48  ;;  %1246 = vperm.xlu1 %2072, %v168_v49   ;;  %1241 = vperm.xlu0 %2071, %v167_v50   ;;  %v350_v47 = vld [vmem:[%s4370_s1 + $0x368] sm:$0xff]  ;;  %v349_v48 = vld [vmem:[%s4370_s1 + $0x360] sm:$0xff]  ;;  %v184_v49 = vld [vmem:[%s4369_s0 + $0x558] sm:$0xff] }
 0x137   :  { %v183_v50 = vld [vmem:[%s4369_s0 + $0x550] sm:$0xff] }
 0x138   :  { %1931 = vst.msk [vmem:[%s4371_s2 + $0x2e8] sm:$0xff] %vm1837_vm0, %v1702_v53  ;;  %1930 = vst.msk [vmem:[%s4371_s2 + $0x2e0] sm:$0xff] %vm1837_vm0, %v1701_v54 }
 0x139   :  { %v947_v59 = vpop.permute.xlu1 %946  ;;  %v942_v60 = vpop.permute.xlu0 %941 }
 0x13a   :  { %v1704_v61 = vmul.f32 %v947_v59, %v336_v55  ;;  %v1703_v62 = vmul.f32 %v942_v60, %v335_v56  ;;  %1256 = vperm.xlu1 %2072, %v170_v57   ;;  %1251 = vperm.xlu0 %2071, %v169_v58   ;;  %v352_v55 = vld [vmem:[%s4370_s1 + $0x378] sm:$0xff]  ;;  %v351_v56 = vld [vmem:[%s4370_s1 + $0x370] sm:$0xff]  ;;  %v186_v57 = vld [vmem:[%s4369_s0 + $0x568] sm:$0xff] }
 0x13b   :  { %v185_v58 = vld [vmem:[%s4369_s0 + $0x560] sm:$0xff] }
 0x13c   :  { %1933 = vst.msk [vmem:[%s4371_s2 + $0x2f8] sm:$0xff] %vm1837_vm0, %v1704_v61  ;;  %1932 = vst.msk [vmem:[%s4371_s2 + $0x2f0] sm:$0xff] %vm1837_vm0, %v1703_v62 }
 0x13d   :  { %v957_v3 = vpop.permute.xlu1 %956  ;;  %v952_v4 = vpop.permute.xlu0 %951 }
 0x13e   :  { %v1706_v5 = vmul.f32 %v957_v3, %v338_v63  ;;  %v1705_v6 = vmul.f32 %v952_v4, %v337_v0  ;;  %1266 = vperm.xlu1 %2072, %v172_v1   ;;  %1261 = vperm.xlu0 %2071, %v171_v2   ;;  %v354_v63 = vld [vmem:[%s4370_s1 + $0x388] sm:$0xff]  ;;  %v353_v0 = vld [vmem:[%s4370_s1 + $0x380] sm:$0xff]  ;;  %v188_v1 = vld [vmem:[%s4369_s0 + $0x578] sm:$0xff] }
 0x13f   :  { %v187_v2 = vld [vmem:[%s4369_s0 + $0x570] sm:$0xff] }
 0x140   :  { %1935 = vst.msk [vmem:[%s4371_s2 + $0x308] sm:$0xff] %vm1837_vm0, %v1706_v5  ;;  %1934 = vst.msk [vmem:[%s4371_s2 + $0x300] sm:$0xff] %vm1837_vm0, %v1705_v6 }
 0x141   :  { %v967_v11 = vpop.permute.xlu1 %966  ;;  %v962_v12 = vpop.permute.xlu0 %961 }
 0x142   :  { %v1708_v13 = vmul.f32 %v967_v11, %v340_v7  ;;  %v1707_v14 = vmul.f32 %v962_v12, %v339_v8  ;;  %1276 = vperm.xlu1 %2072, %v174_v9   ;;  %1271 = vperm.xlu0 %2071, %v173_v10   ;;  %v356_v7 = vld [vmem:[%s4370_s1 + $0x398] sm:$0xff]  ;;  %v355_v8 = vld [vmem:[%s4370_s1 + $0x390] sm:$0xff]  ;;  %v190_v9 = vld [vmem:[%s4369_s0 + $0x588] sm:$0xff] }
 0x143   :  { %v189_v10 = vld [vmem:[%s4369_s0 + $0x580] sm:$0xff] }
 0x144   :  { %1937 = vst.msk [vmem:[%s4371_s2 + $0x318] sm:$0xff] %vm1837_vm0, %v1708_v13  ;;  %1936 = vst.msk [vmem:[%s4371_s2 + $0x310] sm:$0xff] %vm1837_vm0, %v1707_v14 }
 0x145   :  { %v977_v19 = vpop.permute.xlu1 %976  ;;  %v972_v20 = vpop.permute.xlu0 %971 }
 0x146   :  { %v1710_v21 = vmul.f32 %v977_v19, %v342_v15  ;;  %v1709_v22 = vmul.f32 %v972_v20, %v341_v16  ;;  %1286 = vperm.xlu1 %2072, %v176_v17   ;;  %1281 = vperm.xlu0 %2071, %v175_v18   ;;  %v358_v15 = vld [vmem:[%s4370_s1 + $0x3a8] sm:$0xff]  ;;  %v357_v16 = vld [vmem:[%s4370_s1 + $0x3a0] sm:$0xff]  ;;  %v192_v17 = vld [vmem:[%s4369_s0 + $0x598] sm:$0xff] }
 0x147   :  { %v191_v18 = vld [vmem:[%s4369_s0 + $0x590] sm:$0xff] }
 0x148   :  { %1939 = vst.msk [vmem:[%s4371_s2 + $0x328] sm:$0xff] %vm1837_vm0, %v1710_v21  ;;  %1938 = vst.msk [vmem:[%s4371_s2 + $0x320] sm:$0xff] %vm1837_vm0, %v1709_v22 }
 0x149   :  { %v987_v27 = vpop.permute.xlu1 %986  ;;  %v982_v28 = vpop.permute.xlu0 %981 }
 0x14a   :  { %v1712_v29 = vmul.f32 %v987_v27, %v344_v23  ;;  %v1711_v30 = vmul.f32 %v982_v28, %v343_v24  ;;  %1296 = vperm.xlu1 %2072, %v178_v25   ;;  %1291 = vperm.xlu0 %2071, %v177_v26   ;;  %v360_v23 = vld [vmem:[%s4370_s1 + $0x3b8] sm:$0xff]  ;;  %v359_v24 = vld [vmem:[%s4370_s1 + $0x3b0] sm:$0xff]  ;;  %v194_v25 = vld [vmem:[%s4369_s0 + $0x5a8] sm:$0xff] }
 0x14b   :  { %v193_v26 = vld [vmem:[%s4369_s0 + $0x5a0] sm:$0xff] }
 0x14c   :  { %1941 = vst.msk [vmem:[%s4371_s2 + $0x338] sm:$0xff] %vm1837_vm0, %v1712_v29  ;;  %1940 = vst.msk [vmem:[%s4371_s2 + $0x330] sm:$0xff] %vm1837_vm0, %v1711_v30 }
 0x14d   :  { %v997_v35 = vpop.permute.xlu1 %996  ;;  %v992_v36 = vpop.permute.xlu0 %991 }
 0x14e   :  { %v1714_v37 = vmul.f32 %v997_v35, %v346_v31  ;;  %v1713_v38 = vmul.f32 %v992_v36, %v345_v32  ;;  %1306 = vperm.xlu1 %2072, %v180_v33   ;;  %1301 = vperm.xlu0 %2071, %v179_v34   ;;  %v362_v31 = vld [vmem:[%s4370_s1 + $0x3c8] sm:$0xff]  ;;  %v361_v32 = vld [vmem:[%s4370_s1 + $0x3c0] sm:$0xff]  ;;  %v196_v33 = vld [vmem:[%s4369_s0 + $0x5b8] sm:$0xff] }
 0x14f   :  { %v195_v34 = vld [vmem:[%s4369_s0 + $0x5b0] sm:$0xff] }
 0x150   :  { %1943 = vst.msk [vmem:[%s4371_s2 + $0x348] sm:$0xff] %vm1837_vm0, %v1714_v37  ;;  %1942 = vst.msk [vmem:[%s4371_s2 + $0x340] sm:$0xff] %vm1837_vm0, %v1713_v38 }
 0x151   :  { %v1007_v43 = vpop.permute.xlu1 %1006  ;;  %v1002_v44 = vpop.permute.xlu0 %1001 }
 0x152   :  { %v1716_v45 = vmul.f32 %v1007_v43, %v348_v39  ;;  %v1715_v46 = vmul.f32 %v1002_v44, %v347_v40  ;;  %1316 = vperm.xlu1 %2072, %v182_v41   ;;  %1311 = vperm.xlu0 %2071, %v181_v42   ;;  %v364_v39 = vld [vmem:[%s4370_s1 + $0x3d8] sm:$0xff]  ;;  %v363_v40 = vld [vmem:[%s4370_s1 + $0x3d0] sm:$0xff]  ;;  %v198_v41 = vld [vmem:[%s4369_s0 + $0x5c8] sm:$0xff] }
 0x153   :  { %v197_v42 = vld [vmem:[%s4369_s0 + $0x5c0] sm:$0xff] }
 0x154   :  { %1945 = vst.msk [vmem:[%s4371_s2 + $0x358] sm:$0xff] %vm1837_vm0, %v1716_v45  ;;  %1944 = vst.msk [vmem:[%s4371_s2 + $0x350] sm:$0xff] %vm1837_vm0, %v1715_v46 }
 0x155   :  { %v1017_v51 = vpop.permute.xlu1 %1016  ;;  %v1012_v52 = vpop.permute.xlu0 %1011 }
 0x156   :  { %v1718_v53 = vmul.f32 %v1017_v51, %v350_v47  ;;  %v1717_v54 = vmul.f32 %v1012_v52, %v349_v48  ;;  %1326 = vperm.xlu1 %2072, %v184_v49   ;;  %1321 = vperm.xlu0 %2071, %v183_v50   ;;  %v366_v47 = vld [vmem:[%s4370_s1 + $0x3e8] sm:$0xff]  ;;  %v365_v48 = vld [vmem:[%s4370_s1 + $0x3e0] sm:$0xff]  ;;  %v200_v49 = vld [vmem:[%s4369_s0 + $0x5d8] sm:$0xff] }
 0x157   :  { %v199_v50 = vld [vmem:[%s4369_s0 + $0x5d0] sm:$0xff] }
 0x158   :  { %1947 = vst.msk [vmem:[%s4371_s2 + $0x368] sm:$0xff] %vm1837_vm0, %v1718_v53  ;;  %1946 = vst.msk [vmem:[%s4371_s2 + $0x360] sm:$0xff] %vm1837_vm0, %v1717_v54 }
 0x159   :  { %v1027_v59 = vpop.permute.xlu1 %1026  ;;  %v1022_v60 = vpop.permute.xlu0 %1021 }
 0x15a   :  { %v1720_v61 = vmul.f32 %v1027_v59, %v352_v55  ;;  %v1719_v62 = vmul.f32 %v1022_v60, %v351_v56  ;;  %1336 = vperm.xlu1 %2072, %v186_v57   ;;  %1331 = vperm.xlu0 %2071, %v185_v58   ;;  %v368_v55 = vld [vmem:[%s4370_s1 + $0x3f8] sm:$0xff]  ;;  %v367_v56 = vld [vmem:[%s4370_s1 + $0x3f0] sm:$0xff]  ;;  %v202_v57 = vld [vmem:[%s4369_s0 + $0x5e8] sm:$0xff] }
 0x15b   :  { %v201_v58 = vld [vmem:[%s4369_s0 + $0x5e0] sm:$0xff] }
 0x15c   :  { %1949 = vst.msk [vmem:[%s4371_s2 + $0x378] sm:$0xff] %vm1837_vm0, %v1720_v61  ;;  %1948 = vst.msk [vmem:[%s4371_s2 + $0x370] sm:$0xff] %vm1837_vm0, %v1719_v62 }
 0x15d   :  { %v1037_v3 = vpop.permute.xlu1 %1036  ;;  %v1032_v4 = vpop.permute.xlu0 %1031 }
 0x15e   :  { %v1722_v5 = vmul.f32 %v1037_v3, %v354_v63  ;;  %v1721_v6 = vmul.f32 %v1032_v4, %v353_v0  ;;  %1346 = vperm.xlu1 %2072, %v188_v1   ;;  %1341 = vperm.xlu0 %2071, %v187_v2   ;;  %v370_v63 = vld [vmem:[%s4370_s1 + $0x408] sm:$0xff]  ;;  %v369_v0 = vld [vmem:[%s4370_s1 + $0x400] sm:$0xff]  ;;  %v204_v1 = vld [vmem:[%s4369_s0 + $0x5f8] sm:$0xff] }
 0x15f   :  { %v203_v2 = vld [vmem:[%s4369_s0 + $0x5f0] sm:$0xff] }
 0x160   :  { %1951 = vst.msk [vmem:[%s4371_s2 + $0x388] sm:$0xff] %vm1837_vm0, %v1722_v5  ;;  %1950 = vst.msk [vmem:[%s4371_s2 + $0x380] sm:$0xff] %vm1837_vm0, %v1721_v6 }
 0x161   :  { %v1047_v11 = vpop.permute.xlu1 %1046  ;;  %v1042_v12 = vpop.permute.xlu0 %1041 }
 0x162   :  { %v1724_v13 = vmul.f32 %v1047_v11, %v356_v7  ;;  %v1723_v14 = vmul.f32 %v1042_v12, %v355_v8  ;;  %1356 = vperm.xlu1 %2072, %v190_v9   ;;  %1351 = vperm.xlu0 %2071, %v189_v10   ;;  %v372_v7 = vld [vmem:[%s4370_s1 + $0x418] sm:$0xff]  ;;  %v371_v8 = vld [vmem:[%s4370_s1 + $0x410] sm:$0xff]  ;;  %v206_v9 = vld [vmem:[%s4369_s0 + $0x608] sm:$0xff] }
 0x163   :  { %v205_v10 = vld [vmem:[%s4369_s0 + $0x600] sm:$0xff] }
 0x164   :  { %1953 = vst.msk [vmem:[%s4371_s2 + $0x398] sm:$0xff] %vm1837_vm0, %v1724_v13  ;;  %1952 = vst.msk [vmem:[%s4371_s2 + $0x390] sm:$0xff] %vm1837_vm0, %v1723_v14 }
 0x165   :  { %v1057_v19 = vpop.permute.xlu1 %1056  ;;  %v1052_v20 = vpop.permute.xlu0 %1051 }
 0x166   :  { %v1726_v21 = vmul.f32 %v1057_v19, %v358_v15  ;;  %v1725_v22 = vmul.f32 %v1052_v20, %v357_v16  ;;  %1366 = vperm.xlu1 %2072, %v192_v17   ;;  %1361 = vperm.xlu0 %2071, %v191_v18   ;;  %v374_v15 = vld [vmem:[%s4370_s1 + $0x428] sm:$0xff]  ;;  %v373_v16 = vld [vmem:[%s4370_s1 + $0x420] sm:$0xff]  ;;  %v208_v17 = vld [vmem:[%s4369_s0 + $0x618] sm:$0xff] }
 0x167   :  { %v207_v18 = vld [vmem:[%s4369_s0 + $0x610] sm:$0xff] }
 0x168   :  { %1955 = vst.msk [vmem:[%s4371_s2 + $0x3a8] sm:$0xff] %vm1837_vm0, %v1726_v21  ;;  %1954 = vst.msk [vmem:[%s4371_s2 + $0x3a0] sm:$0xff] %vm1837_vm0, %v1725_v22 }
 0x169   :  { %v1067_v27 = vpop.permute.xlu1 %1066  ;;  %v1062_v28 = vpop.permute.xlu0 %1061 }
 0x16a   :  { %v1728_v29 = vmul.f32 %v1067_v27, %v360_v23  ;;  %v1727_v30 = vmul.f32 %v1062_v28, %v359_v24  ;;  %1376 = vperm.xlu1 %2072, %v194_v25   ;;  %1371 = vperm.xlu0 %2071, %v193_v26   ;;  %v376_v23 = vld [vmem:[%s4370_s1 + $0x438] sm:$0xff]  ;;  %v375_v24 = vld [vmem:[%s4370_s1 + $0x430] sm:$0xff]  ;;  %v210_v25 = vld [vmem:[%s4369_s0 + $0x628] sm:$0xff] }
 0x16b   :  { %v209_v26 = vld [vmem:[%s4369_s0 + $0x620] sm:$0xff] }
 0x16c   :  { %1957 = vst.msk [vmem:[%s4371_s2 + $0x3b8] sm:$0xff] %vm1837_vm0, %v1728_v29  ;;  %1956 = vst.msk [vmem:[%s4371_s2 + $0x3b0] sm:$0xff] %vm1837_vm0, %v1727_v30 }
 0x16d   :  { %v1077_v35 = vpop.permute.xlu1 %1076  ;;  %v1072_v36 = vpop.permute.xlu0 %1071 }
 0x16e   :  { %v1730_v37 = vmul.f32 %v1077_v35, %v362_v31  ;;  %v1729_v38 = vmul.f32 %v1072_v36, %v361_v32  ;;  %1386 = vperm.xlu1 %2072, %v196_v33   ;;  %1381 = vperm.xlu0 %2071, %v195_v34   ;;  %v378_v31 = vld [vmem:[%s4370_s1 + $0x448] sm:$0xff]  ;;  %v377_v32 = vld [vmem:[%s4370_s1 + $0x440] sm:$0xff]  ;;  %v212_v33 = vld [vmem:[%s4369_s0 + $0x638] sm:$0xff] }
 0x16f   :  { %v211_v34 = vld [vmem:[%s4369_s0 + $0x630] sm:$0xff] }
 0x170   :  { %1959 = vst.msk [vmem:[%s4371_s2 + $0x3c8] sm:$0xff] %vm1837_vm0, %v1730_v37  ;;  %1958 = vst.msk [vmem:[%s4371_s2 + $0x3c0] sm:$0xff] %vm1837_vm0, %v1729_v38 }
 0x171   :  { %v1087_v43 = vpop.permute.xlu1 %1086  ;;  %v1082_v44 = vpop.permute.xlu0 %1081 }
 0x172   :  { %v1732_v45 = vmul.f32 %v1087_v43, %v364_v39  ;;  %v1731_v46 = vmul.f32 %v1082_v44, %v363_v40  ;;  %1396 = vperm.xlu1 %2072, %v198_v41   ;;  %1391 = vperm.xlu0 %2071, %v197_v42   ;;  %v380_v39 = vld [vmem:[%s4370_s1 + $0x458] sm:$0xff]  ;;  %v379_v40 = vld [vmem:[%s4370_s1 + $0x450] sm:$0xff]  ;;  %v214_v41 = vld [vmem:[%s4369_s0 + $0x648] sm:$0xff] }
 0x173   :  { %v213_v42 = vld [vmem:[%s4369_s0 + $0x640] sm:$0xff] }
 0x174   :  { %1961 = vst.msk [vmem:[%s4371_s2 + $0x3d8] sm:$0xff] %vm1837_vm0, %v1732_v45  ;;  %1960 = vst.msk [vmem:[%s4371_s2 + $0x3d0] sm:$0xff] %vm1837_vm0, %v1731_v46 }
 0x175   :  { %v1097_v51 = vpop.permute.xlu1 %1096  ;;  %v1092_v52 = vpop.permute.xlu0 %1091 }
 0x176   :  { %v1734_v53 = vmul.f32 %v1097_v51, %v366_v47  ;;  %v1733_v54 = vmul.f32 %v1092_v52, %v365_v48  ;;  %1406 = vperm.xlu1 %2072, %v200_v49   ;;  %1401 = vperm.xlu0 %2071, %v199_v50   ;;  %v382_v47 = vld [vmem:[%s4370_s1 + $0x468] sm:$0xff]  ;;  %v381_v48 = vld [vmem:[%s4370_s1 + $0x460] sm:$0xff]  ;;  %v216_v49 = vld [vmem:[%s4369_s0 + $0x658] sm:$0xff] }
 0x177   :  { %v215_v50 = vld [vmem:[%s4369_s0 + $0x650] sm:$0xff] }
 0x178   :  { %1963 = vst.msk [vmem:[%s4371_s2 + $0x3e8] sm:$0xff] %vm1837_vm0, %v1734_v53  ;;  %1962 = vst.msk [vmem:[%s4371_s2 + $0x3e0] sm:$0xff] %vm1837_vm0, %v1733_v54 }
 0x179   :  { %v1107_v59 = vpop.permute.xlu1 %1106  ;;  %v1102_v60 = vpop.permute.xlu0 %1101 }
 0x17a   :  { %v1736_v61 = vmul.f32 %v1107_v59, %v368_v55  ;;  %v1735_v62 = vmul.f32 %v1102_v60, %v367_v56  ;;  %1416 = vperm.xlu1 %2072, %v202_v57   ;;  %1411 = vperm.xlu0 %2071, %v201_v58   ;;  %v384_v55 = vld [vmem:[%s4370_s1 + $0x478] sm:$0xff]  ;;  %v383_v56 = vld [vmem:[%s4370_s1 + $0x470] sm:$0xff]  ;;  %v218_v57 = vld [vmem:[%s4369_s0 + $0x668] sm:$0xff] }
 0x17b   :  { %v217_v58 = vld [vmem:[%s4369_s0 + $0x660] sm:$0xff] }
 0x17c   :  { %1965 = vst.msk [vmem:[%s4371_s2 + $0x3f8] sm:$0xff] %vm1837_vm0, %v1736_v61  ;;  %1964 = vst.msk [vmem:[%s4371_s2 + $0x3f0] sm:$0xff] %vm1837_vm0, %v1735_v62 }
 0x17d   :  { %v1117_v3 = vpop.permute.xlu1 %1116  ;;  %v1112_v4 = vpop.permute.xlu0 %1111 }
 0x17e   :  { %v1738_v5 = vmul.f32 %v1117_v3, %v370_v63  ;;  %v1737_v6 = vmul.f32 %v1112_v4, %v369_v0  ;;  %1426 = vperm.xlu1 %2072, %v204_v1   ;;  %1421 = vperm.xlu0 %2071, %v203_v2   ;;  %v386_v63 = vld [vmem:[%s4370_s1 + $0x488] sm:$0xff]  ;;  %v385_v0 = vld [vmem:[%s4370_s1 + $0x480] sm:$0xff]  ;;  %v220_v1 = vld [vmem:[%s4369_s0 + $0x678] sm:$0xff] }
 0x17f   :  { %v219_v2 = vld [vmem:[%s4369_s0 + $0x670] sm:$0xff] }
 0x180   :  { %1967 = vst.msk [vmem:[%s4371_s2 + $0x408] sm:$0xff] %vm1837_vm0, %v1738_v5  ;;  %1966 = vst.msk [vmem:[%s4371_s2 + $0x400] sm:$0xff] %vm1837_vm0, %v1737_v6 }
 0x181   :  { %v1127_v11 = vpop.permute.xlu1 %1126  ;;  %v1122_v12 = vpop.permute.xlu0 %1121 }
 0x182   :  { %v1740_v13 = vmul.f32 %v1127_v11, %v372_v7  ;;  %v1739_v14 = vmul.f32 %v1122_v12, %v371_v8  ;;  %1436 = vperm.xlu1 %2072, %v206_v9   ;;  %1431 = vperm.xlu0 %2071, %v205_v10   ;;  %v388_v7 = vld [vmem:[%s4370_s1 + $0x498] sm:$0xff]  ;;  %v387_v8 = vld [vmem:[%s4370_s1 + $0x490] sm:$0xff]  ;;  %v222_v9 = vld [vmem:[%s4369_s0 + $0x688] sm:$0xff] }
 0x183   :  { %v221_v10 = vld [vmem:[%s4369_s0 + $0x680] sm:$0xff] }
 0x184   :  { %1969 = vst.msk [vmem:[%s4371_s2 + $0x418] sm:$0xff] %vm1837_vm0, %v1740_v13  ;;  %1968 = vst.msk [vmem:[%s4371_s2 + $0x410] sm:$0xff] %vm1837_vm0, %v1739_v14 }
 0x185   :  { %v1137_v19 = vpop.permute.xlu1 %1136  ;;  %v1132_v20 = vpop.permute.xlu0 %1131 }
 0x186   :  { %v1742_v21 = vmul.f32 %v1137_v19, %v374_v15  ;;  %v1741_v22 = vmul.f32 %v1132_v20, %v373_v16  ;;  %1446 = vperm.xlu1 %2072, %v208_v17   ;;  %1441 = vperm.xlu0 %2071, %v207_v18   ;;  %v390_v15 = vld [vmem:[%s4370_s1 + $0x4a8] sm:$0xff]  ;;  %v389_v16 = vld [vmem:[%s4370_s1 + $0x4a0] sm:$0xff]  ;;  %v224_v17 = vld [vmem:[%s4369_s0 + $0x698] sm:$0xff] }
 0x187   :  { %v223_v18 = vld [vmem:[%s4369_s0 + $0x690] sm:$0xff] }
 0x188   :  { %1971 = vst.msk [vmem:[%s4371_s2 + $0x428] sm:$0xff] %vm1837_vm0, %v1742_v21  ;;  %1970 = vst.msk [vmem:[%s4371_s2 + $0x420] sm:$0xff] %vm1837_vm0, %v1741_v22 }
 0x189   :  { %v1147_v27 = vpop.permute.xlu1 %1146  ;;  %v1142_v28 = vpop.permute.xlu0 %1141 }
 0x18a   :  { %v1744_v29 = vmul.f32 %v1147_v27, %v376_v23  ;;  %v1743_v30 = vmul.f32 %v1142_v28, %v375_v24  ;;  %1456 = vperm.xlu1 %2072, %v210_v25   ;;  %1451 = vperm.xlu0 %2071, %v209_v26   ;;  %v392_v23 = vld [vmem:[%s4370_s1 + $0x4b8] sm:$0xff]  ;;  %v391_v24 = vld [vmem:[%s4370_s1 + $0x4b0] sm:$0xff]  ;;  %v226_v25 = vld [vmem:[%s4369_s0 + $0x6a8] sm:$0xff] }
 0x18b   :  { %v225_v26 = vld [vmem:[%s4369_s0 + $0x6a0] sm:$0xff] }
 0x18c   :  { %1973 = vst.msk [vmem:[%s4371_s2 + $0x438] sm:$0xff] %vm1837_vm0, %v1744_v29  ;;  %1972 = vst.msk [vmem:[%s4371_s2 + $0x430] sm:$0xff] %vm1837_vm0, %v1743_v30 }
 0x18d   :  { %v1157_v35 = vpop.permute.xlu1 %1156  ;;  %v1152_v36 = vpop.permute.xlu0 %1151 }
 0x18e   :  { %v1746_v37 = vmul.f32 %v1157_v35, %v378_v31  ;;  %v1745_v38 = vmul.f32 %v1152_v36, %v377_v32  ;;  %1466 = vperm.xlu1 %2072, %v212_v33   ;;  %1461 = vperm.xlu0 %2071, %v211_v34   ;;  %v394_v31 = vld [vmem:[%s4370_s1 + $0x4c8] sm:$0xff]  ;;  %v393_v32 = vld [vmem:[%s4370_s1 + $0x4c0] sm:$0xff]  ;;  %v228_v33 = vld [vmem:[%s4369_s0 + $0x6b8] sm:$0xff] }
 0x18f   :  { %v227_v34 = vld [vmem:[%s4369_s0 + $0x6b0] sm:$0xff] }
 0x190   :  { %1975 = vst.msk [vmem:[%s4371_s2 + $0x448] sm:$0xff] %vm1837_vm0, %v1746_v37  ;;  %1974 = vst.msk [vmem:[%s4371_s2 + $0x440] sm:$0xff] %vm1837_vm0, %v1745_v38 }
 0x191   :  { %v1167_v43 = vpop.permute.xlu1 %1166  ;;  %v1162_v44 = vpop.permute.xlu0 %1161 }
 0x192   :  { %v1748_v45 = vmul.f32 %v1167_v43, %v380_v39  ;;  %v1747_v46 = vmul.f32 %v1162_v44, %v379_v40  ;;  %1476 = vperm.xlu1 %2072, %v214_v41   ;;  %1471 = vperm.xlu0 %2071, %v213_v42   ;;  %v396_v39 = vld [vmem:[%s4370_s1 + $0x4d8] sm:$0xff]  ;;  %v395_v40 = vld [vmem:[%s4370_s1 + $0x4d0] sm:$0xff]  ;;  %v230_v41 = vld [vmem:[%s4369_s0 + $0x6c8] sm:$0xff] }
 0x193   :  { %v229_v42 = vld [vmem:[%s4369_s0 + $0x6c0] sm:$0xff] }
 0x194   :  { %1977 = vst.msk [vmem:[%s4371_s2 + $0x458] sm:$0xff] %vm1837_vm0, %v1748_v45  ;;  %1976 = vst.msk [vmem:[%s4371_s2 + $0x450] sm:$0xff] %vm1837_vm0, %v1747_v46 }
 0x195   :  { %v1177_v51 = vpop.permute.xlu1 %1176  ;;  %v1172_v52 = vpop.permute.xlu0 %1171 }
 0x196   :  { %v1750_v53 = vmul.f32 %v1177_v51, %v382_v47  ;;  %v1749_v54 = vmul.f32 %v1172_v52, %v381_v48  ;;  %1486 = vperm.xlu1 %2072, %v216_v49   ;;  %1481 = vperm.xlu0 %2071, %v215_v50   ;;  %v398_v47 = vld [vmem:[%s4370_s1 + $0x4e8] sm:$0xff]  ;;  %v397_v48 = vld [vmem:[%s4370_s1 + $0x4e0] sm:$0xff]  ;;  %v232_v49 = vld [vmem:[%s4369_s0 + $0x6d8] sm:$0xff] }
 0x197   :  { %v231_v50 = vld [vmem:[%s4369_s0 + $0x6d0] sm:$0xff] }
 0x198   :  { %1979 = vst.msk [vmem:[%s4371_s2 + $0x468] sm:$0xff] %vm1837_vm0, %v1750_v53  ;;  %1978 = vst.msk [vmem:[%s4371_s2 + $0x460] sm:$0xff] %vm1837_vm0, %v1749_v54 }
 0x199   :  { %v1187_v59 = vpop.permute.xlu1 %1186  ;;  %v1182_v60 = vpop.permute.xlu0 %1181 }
 0x19a   :  { %v1752_v61 = vmul.f32 %v1187_v59, %v384_v55  ;;  %v1751_v62 = vmul.f32 %v1182_v60, %v383_v56  ;;  %1496 = vperm.xlu1 %2072, %v218_v57   ;;  %1491 = vperm.xlu0 %2071, %v217_v58   ;;  %v400_v55 = vld [vmem:[%s4370_s1 + $0x4f8] sm:$0xff]  ;;  %v399_v56 = vld [vmem:[%s4370_s1 + $0x4f0] sm:$0xff]  ;;  %v234_v57 = vld [vmem:[%s4369_s0 + $0x6e8] sm:$0xff] }
 0x19b   :  { %v233_v58 = vld [vmem:[%s4369_s0 + $0x6e0] sm:$0xff] }
 0x19c   :  { %1981 = vst.msk [vmem:[%s4371_s2 + $0x478] sm:$0xff] %vm1837_vm0, %v1752_v61  ;;  %1980 = vst.msk [vmem:[%s4371_s2 + $0x470] sm:$0xff] %vm1837_vm0, %v1751_v62 }
 0x19d   :  { %v1197_v3 = vpop.permute.xlu1 %1196  ;;  %v1192_v4 = vpop.permute.xlu0 %1191 }
 0x19e   :  { %v1754_v5 = vmul.f32 %v1197_v3, %v386_v63  ;;  %v1753_v6 = vmul.f32 %v1192_v4, %v385_v0  ;;  %1506 = vperm.xlu1 %2072, %v220_v1   ;;  %1501 = vperm.xlu0 %2071, %v219_v2   ;;  %v402_v63 = vld [vmem:[%s4370_s1 + $0x508] sm:$0xff]  ;;  %v401_v0 = vld [vmem:[%s4370_s1 + $0x500] sm:$0xff]  ;;  %v236_v1 = vld [vmem:[%s4369_s0 + $0x6f8] sm:$0xff] }
 0x19f   :  { %v235_v2 = vld [vmem:[%s4369_s0 + $0x6f0] sm:$0xff] }
 0x1a0   :  { %1983 = vst.msk [vmem:[%s4371_s2 + $0x488] sm:$0xff] %vm1837_vm0, %v1754_v5  ;;  %1982 = vst.msk [vmem:[%s4371_s2 + $0x480] sm:$0xff] %vm1837_vm0, %v1753_v6 }
 0x1a1   :  { %v1207_v11 = vpop.permute.xlu1 %1206  ;;  %v1202_v12 = vpop.permute.xlu0 %1201 }
 0x1a2   :  { %v1756_v13 = vmul.f32 %v1207_v11, %v388_v7  ;;  %v1755_v14 = vmul.f32 %v1202_v12, %v387_v8  ;;  %1516 = vperm.xlu1 %2072, %v222_v9   ;;  %1511 = vperm.xlu0 %2071, %v221_v10   ;;  %v404_v7 = vld [vmem:[%s4370_s1 + $0x518] sm:$0xff]  ;;  %v403_v8 = vld [vmem:[%s4370_s1 + $0x510] sm:$0xff]  ;;  %v238_v9 = vld [vmem:[%s4369_s0 + $0x708] sm:$0xff] }
 0x1a3   :  { %v237_v10 = vld [vmem:[%s4369_s0 + $0x700] sm:$0xff] }
 0x1a4   :  { %1985 = vst.msk [vmem:[%s4371_s2 + $0x498] sm:$0xff] %vm1837_vm0, %v1756_v13  ;;  %1984 = vst.msk [vmem:[%s4371_s2 + $0x490] sm:$0xff] %vm1837_vm0, %v1755_v14 }
 0x1a5   :  { %v1217_v19 = vpop.permute.xlu1 %1216  ;;  %v1212_v20 = vpop.permute.xlu0 %1211 }
 0x1a6   :  { %v1758_v21 = vmul.f32 %v1217_v19, %v390_v15  ;;  %v1757_v22 = vmul.f32 %v1212_v20, %v389_v16  ;;  %1526 = vperm.xlu1 %2072, %v224_v17   ;;  %1521 = vperm.xlu0 %2071, %v223_v18   ;;  %v406_v15 = vld [vmem:[%s4370_s1 + $0x528] sm:$0xff]  ;;  %v405_v16 = vld [vmem:[%s4370_s1 + $0x520] sm:$0xff]  ;;  %v240_v17 = vld [vmem:[%s4369_s0 + $0x718] sm:$0xff] }
 0x1a7   :  { %v239_v18 = vld [vmem:[%s4369_s0 + $0x710] sm:$0xff] }
 0x1a8   :  { %1987 = vst.msk [vmem:[%s4371_s2 + $0x4a8] sm:$0xff] %vm1837_vm0, %v1758_v21  ;;  %1986 = vst.msk [vmem:[%s4371_s2 + $0x4a0] sm:$0xff] %vm1837_vm0, %v1757_v22 }
 0x1a9   :  { %v1227_v27 = vpop.permute.xlu1 %1226  ;;  %v1222_v28 = vpop.permute.xlu0 %1221 }
 0x1aa   :  { %v1760_v29 = vmul.f32 %v1227_v27, %v392_v23  ;;  %v1759_v30 = vmul.f32 %v1222_v28, %v391_v24  ;;  %1536 = vperm.xlu1 %2072, %v226_v25   ;;  %1531 = vperm.xlu0 %2071, %v225_v26   ;;  %v408_v23 = vld [vmem:[%s4370_s1 + $0x538] sm:$0xff]  ;;  %v407_v24 = vld [vmem:[%s4370_s1 + $0x530] sm:$0xff] }
 0x1ac   :  { %1989 = vst.msk [vmem:[%s4371_s2 + $0x4b8] sm:$0xff] %vm1837_vm0, %v1760_v29  ;;  %1988 = vst.msk [vmem:[%s4371_s2 + $0x4b0] sm:$0xff] %vm1837_vm0, %v1759_v30  ;;  %v410_v29 = vld [vmem:[%s4370_s1 + $0x548] sm:$0xff]  ;;  %v409_v30 = vld [vmem:[%s4370_s1 + $0x540] sm:$0xff] }
 0x1ad   :  { %v1237_v35 = vpop.permute.xlu1 %1236  ;;  %v1232_v36 = vpop.permute.xlu0 %1231 }
 0x1ae   :  { %v1762_v37 = vmul.f32 %v1237_v35, %v394_v31  ;;  %v1761_v38 = vmul.f32 %v1232_v36, %v393_v32  ;;  %1546 = vperm.xlu1 %2072, %v228_v33   ;;  %1541 = vperm.xlu0 %2071, %v227_v34   ;;  %v412_v35 = vld [vmem:[%s4370_s1 + $0x558] sm:$0xff]  ;;  %v411_v36 = vld [vmem:[%s4370_s1 + $0x550] sm:$0xff] }
 0x1b0   :  { %1991 = vst.msk [vmem:[%s4371_s2 + $0x4c8] sm:$0xff] %vm1837_vm0, %v1762_v37  ;;  %1990 = vst.msk [vmem:[%s4371_s2 + $0x4c0] sm:$0xff] %vm1837_vm0, %v1761_v38 }
 0x1b1   :  { %v1247_v43 = vpop.permute.xlu1 %1246  ;;  %v1242_v44 = vpop.permute.xlu0 %1241 }
 0x1b2   :  { %v1764_v45 = vmul.f32 %v1247_v43, %v396_v39  ;;  %v1763_v46 = vmul.f32 %v1242_v44, %v395_v40  ;;  %1556 = vperm.xlu1 %2072, %v230_v41   ;;  %1551 = vperm.xlu0 %2071, %v229_v42   ;;  %v414_v41 = vld [vmem:[%s4370_s1 + $0x568] sm:$0xff]  ;;  %v413_v42 = vld [vmem:[%s4370_s1 + $0x560] sm:$0xff] }
 0x1b4   :  { %1993 = vst.msk [vmem:[%s4371_s2 + $0x4d8] sm:$0xff] %vm1837_vm0, %v1764_v45  ;;  %1992 = vst.msk [vmem:[%s4371_s2 + $0x4d0] sm:$0xff] %vm1837_vm0, %v1763_v46 }
 0x1b5   :  { %v1257_v51 = vpop.permute.xlu1 %1256  ;;  %v1252_v52 = vpop.permute.xlu0 %1251 }
 0x1b6   :  { %v1766_v53 = vmul.f32 %v1257_v51, %v398_v47  ;;  %v1765_v54 = vmul.f32 %v1252_v52, %v397_v48  ;;  %1566 = vperm.xlu1 %2072, %v232_v49   ;;  %1561 = vperm.xlu0 %2071, %v231_v50   ;;  %v416_v47 = vld [vmem:[%s4370_s1 + $0x578] sm:$0xff]  ;;  %v415_v48 = vld [vmem:[%s4370_s1 + $0x570] sm:$0xff] }
 0x1b8   :  { %1995 = vst.msk [vmem:[%s4371_s2 + $0x4e8] sm:$0xff] %vm1837_vm0, %v1766_v53  ;;  %1994 = vst.msk [vmem:[%s4371_s2 + $0x4e0] sm:$0xff] %vm1837_vm0, %v1765_v54  ;;  %v418_v53 = vld [vmem:[%s4370_s1 + $0x588] sm:$0xff]  ;;  %v417_v54 = vld [vmem:[%s4370_s1 + $0x580] sm:$0xff] }
 0x1b9   :  { %v1267_v59 = vpop.permute.xlu1 %1266  ;;  %v1262_v60 = vpop.permute.xlu0 %1261 }
 0x1ba   :  { %v1768_v61 = vmul.f32 %v1267_v59, %v400_v55  ;;  %v1767_v62 = vmul.f32 %v1262_v60, %v399_v56  ;;  %1576 = vperm.xlu1 %2072, %v234_v57   ;;  %1571 = vperm.xlu0 %2071, %v233_v58   ;;  %v420_v59 = vld [vmem:[%s4370_s1 + $0x598] sm:$0xff]  ;;  %v419_v60 = vld [vmem:[%s4370_s1 + $0x590] sm:$0xff] }
 0x1bc   :  { %1997 = vst.msk [vmem:[%s4371_s2 + $0x4f8] sm:$0xff] %vm1837_vm0, %v1768_v61  ;;  %1996 = vst.msk [vmem:[%s4371_s2 + $0x4f0] sm:$0xff] %vm1837_vm0, %v1767_v62 }
 0x1bd   :  { %v1277_v3 = vpop.permute.xlu1 %1276  ;;  %v1272_v4 = vpop.permute.xlu0 %1271 }
 0x1be   :  { %v1770_v5 = vmul.f32 %v1277_v3, %v402_v63  ;;  %v1769_v6 = vmul.f32 %v1272_v4, %v401_v0  ;;  %1586 = vperm.xlu1 %2072, %v236_v1   ;;  %1581 = vperm.xlu0 %2071, %v235_v2   ;;  %v422_v1 = vld [vmem:[%s4370_s1 + $0x5a8] sm:$0xff]  ;;  %v421_v2 = vld [vmem:[%s4370_s1 + $0x5a0] sm:$0xff] }
 0x1c0   :  { %1999 = vst.msk [vmem:[%s4371_s2 + $0x508] sm:$0xff] %vm1837_vm0, %v1770_v5  ;;  %1998 = vst.msk [vmem:[%s4371_s2 + $0x500] sm:$0xff] %vm1837_vm0, %v1769_v6 }
 0x1c1   :  { %v1287_v11 = vpop.permute.xlu1 %1286  ;;  %v1282_v12 = vpop.permute.xlu0 %1281 }
 0x1c2   :  { %v1772_v13 = vmul.f32 %v1287_v11, %v404_v7  ;;  %v1771_v14 = vmul.f32 %v1282_v12, %v403_v8  ;;  %1596 = vperm.xlu1 %2072, %v238_v9   ;;  %1591 = vperm.xlu0 %2071, %v237_v10   ;;  %v424_v7 = vld [vmem:[%s4370_s1 + $0x5b8] sm:$0xff]  ;;  %v423_v8 = vld [vmem:[%s4370_s1 + $0x5b0] sm:$0xff] }
 0x1c4   :  { %2001 = vst.msk [vmem:[%s4371_s2 + $0x518] sm:$0xff] %vm1837_vm0, %v1772_v13  ;;  %2000 = vst.msk [vmem:[%s4371_s2 + $0x510] sm:$0xff] %vm1837_vm0, %v1771_v14  ;;  %v426_v13 = vld [vmem:[%s4370_s1 + $0x5c8] sm:$0xff]  ;;  %v425_v14 = vld [vmem:[%s4370_s1 + $0x5c0] sm:$0xff] }
 0x1c5   :  { %v1297_v19 = vpop.permute.xlu1 %1296  ;;  %v1292_v20 = vpop.permute.xlu0 %1291 }
 0x1c6   :  { %v1774_v21 = vmul.f32 %v1297_v19, %v406_v15  ;;  %v1773_v22 = vmul.f32 %v1292_v20, %v405_v16  ;;  %1606 = vperm.xlu1 %2072, %v240_v17   ;;  %1601 = vperm.xlu0 %2071, %v239_v18   ;;  %v428_v19 = vld [vmem:[%s4370_s1 + $0x5d8] sm:$0xff]  ;;  %v427_v20 = vld [vmem:[%s4370_s1 + $0x5d0] sm:$0xff] }
 0x1c8   :  { %2003 = vst.msk [vmem:[%s4371_s2 + $0x528] sm:$0xff] %vm1837_vm0, %v1774_v21  ;;  %2002 = vst.msk [vmem:[%s4371_s2 + $0x520] sm:$0xff] %vm1837_vm0, %v1773_v22 }
 0x1c9   :  { %v1307_v25 = vpop.permute.xlu1 %1306  ;;  %v1302_v26 = vpop.permute.xlu0 %1301 }
 0x1ca   :  { %v1776_v27 = vmul.f32 %v1307_v25, %v408_v23  ;;  %v1775_v28 = vmul.f32 %v1302_v26, %v407_v24  ;;  %v430_v25 = vld [vmem:[%s4370_s1 + $0x5e8] sm:$0xff]  ;;  %v429_v26 = vld [vmem:[%s4370_s1 + $0x5e0] sm:$0xff] }
 0x1cc   :  { %2005 = vst.msk [vmem:[%s4371_s2 + $0x538] sm:$0xff] %vm1837_vm0, %v1776_v27  ;;  %2004 = vst.msk [vmem:[%s4371_s2 + $0x530] sm:$0xff] %vm1837_vm0, %v1775_v28 }
 0x1cd   :  { %v1317_v31 = vpop.permute.xlu1 %1316  ;;  %v1312_v32 = vpop.permute.xlu0 %1311 }
 0x1ce   :  { %v1778_v33 = vmul.f32 %v1317_v31, %v410_v29  ;;  %v1777_v34 = vmul.f32 %v1312_v32, %v409_v30  ;;  %v432_v31 = vld [vmem:[%s4370_s1 + $0x5f8] sm:$0xff]  ;;  %v431_v32 = vld [vmem:[%s4370_s1 + $0x5f0] sm:$0xff] }
 0x1d0   :  { %2007 = vst.msk [vmem:[%s4371_s2 + $0x548] sm:$0xff] %vm1837_vm0, %v1778_v33  ;;  %2006 = vst.msk [vmem:[%s4371_s2 + $0x540] sm:$0xff] %vm1837_vm0, %v1777_v34 }
 0x1d1   :  { %v1327_v37 = vpop.permute.xlu1 %1326  ;;  %v1322_v38 = vpop.permute.xlu0 %1321 }
 0x1d2   :  { %v1780_v39 = vmul.f32 %v1327_v37, %v412_v35  ;;  %v1779_v40 = vmul.f32 %v1322_v38, %v411_v36  ;;  %v434_v37 = vld [vmem:[%s4370_s1 + $0x608] sm:$0xff]  ;;  %v433_v38 = vld [vmem:[%s4370_s1 + $0x600] sm:$0xff] }
 0x1d4   :  { %2009 = vst.msk [vmem:[%s4371_s2 + $0x558] sm:$0xff] %vm1837_vm0, %v1780_v39  ;;  %2008 = vst.msk [vmem:[%s4371_s2 + $0x550] sm:$0xff] %vm1837_vm0, %v1779_v40 }
 0x1d5   :  { %v1337_v43 = vpop.permute.xlu1 %1336  ;;  %v1332_v44 = vpop.permute.xlu0 %1331 }
 0x1d6   :  { %v1782_v45 = vmul.f32 %v1337_v43, %v414_v41  ;;  %v1781_v46 = vmul.f32 %v1332_v44, %v413_v42  ;;  %v436_v43 = vld [vmem:[%s4370_s1 + $0x618] sm:$0xff]  ;;  %v435_v44 = vld [vmem:[%s4370_s1 + $0x610] sm:$0xff] }
 0x1d8   :  { %2011 = vst.msk [vmem:[%s4371_s2 + $0x568] sm:$0xff] %vm1837_vm0, %v1782_v45  ;;  %2010 = vst.msk [vmem:[%s4371_s2 + $0x560] sm:$0xff] %vm1837_vm0, %v1781_v46 }
 0x1d9   :  { %v1347_v49 = vpop.permute.xlu1 %1346  ;;  %v1342_v50 = vpop.permute.xlu0 %1341 }
 0x1da   :  { %v1784_v51 = vmul.f32 %v1347_v49, %v416_v47  ;;  %v1783_v52 = vmul.f32 %v1342_v50, %v415_v48  ;;  %v438_v49 = vld [vmem:[%s4370_s1 + $0x628] sm:$0xff]  ;;  %v437_v50 = vld [vmem:[%s4370_s1 + $0x620] sm:$0xff] }
 0x1dc   :  { %2013 = vst.msk [vmem:[%s4371_s2 + $0x578] sm:$0xff] %vm1837_vm0, %v1784_v51  ;;  %2012 = vst.msk [vmem:[%s4371_s2 + $0x570] sm:$0xff] %vm1837_vm0, %v1783_v52 }
 0x1dd   :  { %v1357_v55 = vpop.permute.xlu1 %1356  ;;  %v1352_v56 = vpop.permute.xlu0 %1351 }
 0x1de   :  { %v1786_v57 = vmul.f32 %v1357_v55, %v418_v53  ;;  %v1785_v58 = vmul.f32 %v1352_v56, %v417_v54  ;;  %v440_v55 = vld [vmem:[%s4370_s1 + $0x638] sm:$0xff]  ;;  %v439_v56 = vld [vmem:[%s4370_s1 + $0x630] sm:$0xff] }
 0x1e0   :  { %2015 = vst.msk [vmem:[%s4371_s2 + $0x588] sm:$0xff] %vm1837_vm0, %v1786_v57  ;;  %2014 = vst.msk [vmem:[%s4371_s2 + $0x580] sm:$0xff] %vm1837_vm0, %v1785_v58 }
 0x1e1   :  { %v1367_v61 = vpop.permute.xlu1 %1366  ;;  %v1362_v62 = vpop.permute.xlu0 %1361 }
 0x1e2   :  { %v1788_v63 = vmul.f32 %v1367_v61, %v420_v59  ;;  %v1787_v0 = vmul.f32 %v1362_v62, %v419_v60  ;;  %v442_v61 = vld [vmem:[%s4370_s1 + $0x648] sm:$0xff]  ;;  %v441_v62 = vld [vmem:[%s4370_s1 + $0x640] sm:$0xff] }
 0x1e4   :  { %2017 = vst.msk [vmem:[%s4371_s2 + $0x598] sm:$0xff] %vm1837_vm0, %v1788_v63  ;;  %2016 = vst.msk [vmem:[%s4371_s2 + $0x590] sm:$0xff] %vm1837_vm0, %v1787_v0 }
 0x1e5   :  { %v1377_v3 = vpop.permute.xlu1 %1376  ;;  %v1372_v4 = vpop.permute.xlu0 %1371 }
 0x1e6   :  { %v1790_v5 = vmul.f32 %v1377_v3, %v422_v1  ;;  %v1789_v6 = vmul.f32 %v1372_v4, %v421_v2  ;;  %v444_v3 = vld [vmem:[%s4370_s1 + $0x658] sm:$0xff]  ;;  %v443_v4 = vld [vmem:[%s4370_s1 + $0x650] sm:$0xff] }
 0x1e8   :  { %2019 = vst.msk [vmem:[%s4371_s2 + $0x5a8] sm:$0xff] %vm1837_vm0, %v1790_v5  ;;  %2018 = vst.msk [vmem:[%s4371_s2 + $0x5a0] sm:$0xff] %vm1837_vm0, %v1789_v6 }
 0x1e9   :  { %v1387_v9 = vpop.permute.xlu1 %1386  ;;  %v1382_v10 = vpop.permute.xlu0 %1381 }
 0x1ea   :  { %v1792_v11 = vmul.f32 %v1387_v9, %v424_v7  ;;  %v1791_v12 = vmul.f32 %v1382_v10, %v423_v8  ;;  %v446_v9 = vld [vmem:[%s4370_s1 + $0x668] sm:$0xff]  ;;  %v445_v10 = vld [vmem:[%s4370_s1 + $0x660] sm:$0xff] }
 0x1ec   :  { %2021 = vst.msk [vmem:[%s4371_s2 + $0x5b8] sm:$0xff] %vm1837_vm0, %v1792_v11  ;;  %2020 = vst.msk [vmem:[%s4371_s2 + $0x5b0] sm:$0xff] %vm1837_vm0, %v1791_v12 }
 0x1ed   :  { %v1397_v15 = vpop.permute.xlu1 %1396  ;;  %v1392_v16 = vpop.permute.xlu0 %1391 }
 0x1ee   :  { %v1794_v17 = vmul.f32 %v1397_v15, %v426_v13  ;;  %v1793_v18 = vmul.f32 %v1392_v16, %v425_v14  ;;  %v448_v15 = vld [vmem:[%s4370_s1 + $0x678] sm:$0xff]  ;;  %v447_v16 = vld [vmem:[%s4370_s1 + $0x670] sm:$0xff] }
 0x1f0   :  { %2023 = vst.msk [vmem:[%s4371_s2 + $0x5c8] sm:$0xff] %vm1837_vm0, %v1794_v17  ;;  %2022 = vst.msk [vmem:[%s4371_s2 + $0x5c0] sm:$0xff] %vm1837_vm0, %v1793_v18 }
 0x1f1   :  { %v1407_v21 = vpop.permute.xlu1 %1406  ;;  %v1402_v22 = vpop.permute.xlu0 %1401 }
 0x1f2   :  { %v1796_v23 = vmul.f32 %v1407_v21, %v428_v19  ;;  %v1795_v24 = vmul.f32 %v1402_v22, %v427_v20  ;;  %v450_v21 = vld [vmem:[%s4370_s1 + $0x688] sm:$0xff]  ;;  %v449_v22 = vld [vmem:[%s4370_s1 + $0x680] sm:$0xff] }
 0x1f4   :  { %2025 = vst.msk [vmem:[%s4371_s2 + $0x5d8] sm:$0xff] %vm1837_vm0, %v1796_v23  ;;  %2024 = vst.msk [vmem:[%s4371_s2 + $0x5d0] sm:$0xff] %vm1837_vm0, %v1795_v24 }
 0x1f5   :  { %v1417_v27 = vpop.permute.xlu1 %1416  ;;  %v1412_v28 = vpop.permute.xlu0 %1411 }
 0x1f6   :  { %v1798_v29 = vmul.f32 %v1417_v27, %v430_v25  ;;  %v1797_v30 = vmul.f32 %v1412_v28, %v429_v26  ;;  %v452_v27 = vld [vmem:[%s4370_s1 + $0x698] sm:$0xff]  ;;  %v451_v28 = vld [vmem:[%s4370_s1 + $0x690] sm:$0xff] }
 0x1f8   :  { %2027 = vst.msk [vmem:[%s4371_s2 + $0x5e8] sm:$0xff] %vm1837_vm0, %v1798_v29  ;;  %2026 = vst.msk [vmem:[%s4371_s2 + $0x5e0] sm:$0xff] %vm1837_vm0, %v1797_v30 }
 0x1f9   :  { %v1427_v33 = vpop.permute.xlu1 %1426  ;;  %v1422_v34 = vpop.permute.xlu0 %1421 }
 0x1fa   :  { %v1800_v35 = vmul.f32 %v1427_v33, %v432_v31  ;;  %v1799_v36 = vmul.f32 %v1422_v34, %v431_v32  ;;  %v454_v33 = vld [vmem:[%s4370_s1 + $0x6a8] sm:$0xff]  ;;  %v453_v34 = vld [vmem:[%s4370_s1 + $0x6a0] sm:$0xff] }
 0x1fc   :  { %2029 = vst.msk [vmem:[%s4371_s2 + $0x5f8] sm:$0xff] %vm1837_vm0, %v1800_v35  ;;  %2028 = vst.msk [vmem:[%s4371_s2 + $0x5f0] sm:$0xff] %vm1837_vm0, %v1799_v36 }
 0x1fd   :  { %v1437_v39 = vpop.permute.xlu1 %1436  ;;  %v1432_v40 = vpop.permute.xlu0 %1431 }
 0x1fe   :  { %v1802_v41 = vmul.f32 %v1437_v39, %v434_v37  ;;  %v1801_v42 = vmul.f32 %v1432_v40, %v433_v38  ;;  %v456_v39 = vld [vmem:[%s4370_s1 + $0x6b8] sm:$0xff]  ;;  %v455_v40 = vld [vmem:[%s4370_s1 + $0x6b0] sm:$0xff] }
 0x200   :  { %2031 = vst.msk [vmem:[%s4371_s2 + $0x608] sm:$0xff] %vm1837_vm0, %v1802_v41  ;;  %2030 = vst.msk [vmem:[%s4371_s2 + $0x600] sm:$0xff] %vm1837_vm0, %v1801_v42 }
 0x201   :  { %v1447_v45 = vpop.permute.xlu1 %1446  ;;  %v1442_v46 = vpop.permute.xlu0 %1441 }
 0x202   :  { %v1804_v47 = vmul.f32 %v1447_v45, %v436_v43  ;;  %v1803_v48 = vmul.f32 %v1442_v46, %v435_v44  ;;  %v458_v45 = vld [vmem:[%s4370_s1 + $0x6c8] sm:$0xff]  ;;  %v457_v46 = vld [vmem:[%s4370_s1 + $0x6c0] sm:$0xff] }
 0x204   :  { %2033 = vst.msk [vmem:[%s4371_s2 + $0x618] sm:$0xff] %vm1837_vm0, %v1804_v47  ;;  %2032 = vst.msk [vmem:[%s4371_s2 + $0x610] sm:$0xff] %vm1837_vm0, %v1803_v48 }
 0x205   :  { %v1457_v51 = vpop.permute.xlu1 %1456  ;;  %v1452_v52 = vpop.permute.xlu0 %1451 }
 0x206   :  { %v1806_v53 = vmul.f32 %v1457_v51, %v438_v49  ;;  %v1805_v54 = vmul.f32 %v1452_v52, %v437_v50  ;;  %v460_v51 = vld [vmem:[%s4370_s1 + $0x6d8] sm:$0xff]  ;;  %v459_v52 = vld [vmem:[%s4370_s1 + $0x6d0] sm:$0xff] }
 0x208   :  { %2035 = vst.msk [vmem:[%s4371_s2 + $0x628] sm:$0xff] %vm1837_vm0, %v1806_v53  ;;  %2034 = vst.msk [vmem:[%s4371_s2 + $0x620] sm:$0xff] %vm1837_vm0, %v1805_v54 }
 0x209   :  { %v1467_v57 = vpop.permute.xlu1 %1466  ;;  %v1462_v58 = vpop.permute.xlu0 %1461 }
 0x20a   :  { %v1808_v59 = vmul.f32 %v1467_v57, %v440_v55  ;;  %v1807_v60 = vmul.f32 %v1462_v58, %v439_v56  ;;  %v462_v57 = vld [vmem:[%s4370_s1 + $0x6e8] sm:$0xff]  ;;  %v461_v58 = vld [vmem:[%s4370_s1 + $0x6e0] sm:$0xff] }
 0x20c   :  { %2037 = vst.msk [vmem:[%s4371_s2 + $0x638] sm:$0xff] %vm1837_vm0, %v1808_v59  ;;  %2036 = vst.msk [vmem:[%s4371_s2 + $0x630] sm:$0xff] %vm1837_vm0, %v1807_v60 }
 0x20d   :  { %v1477_v63 = vpop.permute.xlu1 %1476  ;;  %v1472_v0 = vpop.permute.xlu0 %1471 }
 0x20e   :  { %v1810_v1 = vmul.f32 %v1477_v63, %v442_v61  ;;  %v1809_v2 = vmul.f32 %v1472_v0, %v441_v62  ;;  %v464_v63 = vld [vmem:[%s4370_s1 + $0x6f8] sm:$0xff]  ;;  %v463_v0 = vld [vmem:[%s4370_s1 + $0x6f0] sm:$0xff] }
 0x210   :  { %2039 = vst.msk [vmem:[%s4371_s2 + $0x648] sm:$0xff] %vm1837_vm0, %v1810_v1  ;;  %2038 = vst.msk [vmem:[%s4371_s2 + $0x640] sm:$0xff] %vm1837_vm0, %v1809_v2 }
 0x211   :  { %v1487_v5 = vpop.permute.xlu1 %1486  ;;  %v1482_v6 = vpop.permute.xlu0 %1481 }
 0x212   :  { %v1812_v7 = vmul.f32 %v1487_v5, %v444_v3  ;;  %v1811_v8 = vmul.f32 %v1482_v6, %v443_v4  ;;  %v466_v5 = vld [vmem:[%s4370_s1 + $0x708] sm:$0xff]  ;;  %v465_v6 = vld [vmem:[%s4370_s1 + $0x700] sm:$0xff] }
 0x214   :  { %2041 = vst.msk [vmem:[%s4371_s2 + $0x658] sm:$0xff] %vm1837_vm0, %v1812_v7  ;;  %2040 = vst.msk [vmem:[%s4371_s2 + $0x650] sm:$0xff] %vm1837_vm0, %v1811_v8 }
 0x215   :  { %v1497_v11 = vpop.permute.xlu1 %1496  ;;  %v1492_v12 = vpop.permute.xlu0 %1491 }
 0x216   :  { %v1814_v13 = vmul.f32 %v1497_v11, %v446_v9  ;;  %v1813_v14 = vmul.f32 %v1492_v12, %v445_v10  ;;  %v468_v11 = vld [vmem:[%s4370_s1 + $0x718] sm:$0xff]  ;;  %v467_v12 = vld [vmem:[%s4370_s1 + $0x710] sm:$0xff] }
 0x218   :  { %2043 = vst.msk [vmem:[%s4371_s2 + $0x668] sm:$0xff] %vm1837_vm0, %v1814_v13  ;;  %2042 = vst.msk [vmem:[%s4371_s2 + $0x660] sm:$0xff] %vm1837_vm0, %v1813_v14 }
 0x219   :  { %v1507_v17 = vpop.permute.xlu1 %1506  ;;  %v1502_v18 = vpop.permute.xlu0 %1501 }
 0x21a   :  { %v1816_v19 = vmul.f32 %v1507_v17, %v448_v15  ;;  %v1815_v20 = vmul.f32 %v1502_v18, %v447_v16 }
 0x21c   :  { %2045 = vst.msk [vmem:[%s4371_s2 + $0x678] sm:$0xff] %vm1837_vm0, %v1816_v19  ;;  %2044 = vst.msk [vmem:[%s4371_s2 + $0x670] sm:$0xff] %vm1837_vm0, %v1815_v20 }
 0x21d   :  { %v1517_v23 = vpop.permute.xlu1 %1516  ;;  %v1512_v24 = vpop.permute.xlu0 %1511 }
 0x21e   :  { %v1818_v25 = vmul.f32 %v1517_v23, %v450_v21  ;;  %v1817_v26 = vmul.f32 %v1512_v24, %v449_v22 }
 0x220   :  { %2047 = vst.msk [vmem:[%s4371_s2 + $0x688] sm:$0xff] %vm1837_vm0, %v1818_v25  ;;  %2046 = vst.msk [vmem:[%s4371_s2 + $0x680] sm:$0xff] %vm1837_vm0, %v1817_v26 }
 0x221   :  { %v1527_v29 = vpop.permute.xlu1 %1526  ;;  %v1522_v30 = vpop.permute.xlu0 %1521 }
 0x222   :  { %v1820_v31 = vmul.f32 %v1527_v29, %v452_v27  ;;  %v1819_v32 = vmul.f32 %v1522_v30, %v451_v28 }
 0x224   :  { %2049 = vst.msk [vmem:[%s4371_s2 + $0x698] sm:$0xff] %vm1837_vm0, %v1820_v31  ;;  %2048 = vst.msk [vmem:[%s4371_s2 + $0x690] sm:$0xff] %vm1837_vm0, %v1819_v32 }
 0x225   :  { %v1537_v35 = vpop.permute.xlu1 %1536  ;;  %v1532_v36 = vpop.permute.xlu0 %1531 }
 0x226   :  { %v1822_v37 = vmul.f32 %v1537_v35, %v454_v33  ;;  %v1821_v38 = vmul.f32 %v1532_v36, %v453_v34 }
 0x228   :  { %2051 = vst.msk [vmem:[%s4371_s2 + $0x6a8] sm:$0xff] %vm1837_vm0, %v1822_v37  ;;  %2050 = vst.msk [vmem:[%s4371_s2 + $0x6a0] sm:$0xff] %vm1837_vm0, %v1821_v38 }
 0x229   :  { %v1547_v41 = vpop.permute.xlu1 %1546  ;;  %v1542_v42 = vpop.permute.xlu0 %1541 }
 0x22a   :  { %v1824_v43 = vmul.f32 %v1547_v41, %v456_v39  ;;  %v1823_v44 = vmul.f32 %v1542_v42, %v455_v40 }
 0x22c   :  { %2053 = vst.msk [vmem:[%s4371_s2 + $0x6b8] sm:$0xff] %vm1837_vm0, %v1824_v43  ;;  %2052 = vst.msk [vmem:[%s4371_s2 + $0x6b0] sm:$0xff] %vm1837_vm0, %v1823_v44 }
 0x22d   :  { %v1557_v47 = vpop.permute.xlu1 %1556  ;;  %v1552_v48 = vpop.permute.xlu0 %1551 }
 0x22e   :  { %v1826_v49 = vmul.f32 %v1557_v47, %v458_v45  ;;  %v1825_v50 = vmul.f32 %v1552_v48, %v457_v46 }
 0x230   :  { %2055 = vst.msk [vmem:[%s4371_s2 + $0x6c8] sm:$0xff] %vm1837_vm0, %v1826_v49  ;;  %2054 = vst.msk [vmem:[%s4371_s2 + $0x6c0] sm:$0xff] %vm1837_vm0, %v1825_v50 }
 0x231   :  { %v1567_v53 = vpop.permute.xlu1 %1566  ;;  %v1562_v54 = vpop.permute.xlu0 %1561 }
 0x232   :  { %v1828_v55 = vmul.f32 %v1567_v53, %v460_v51  ;;  %v1827_v56 = vmul.f32 %v1562_v54, %v459_v52 }
 0x234   :  { %2057 = vst.msk [vmem:[%s4371_s2 + $0x6d8] sm:$0xff] %vm1837_vm0, %v1828_v55  ;;  %2056 = vst.msk [vmem:[%s4371_s2 + $0x6d0] sm:$0xff] %vm1837_vm0, %v1827_v56 }
 0x235   :  { %v1577_v59 = vpop.permute.xlu1 %1576  ;;  %v1572_v60 = vpop.permute.xlu0 %1571 }
 0x236   :  { %v1830_v61 = vmul.f32 %v1577_v59, %v462_v57  ;;  %v1829_v62 = vmul.f32 %v1572_v60, %v461_v58 }
 0x238   :  { %2059 = vst.msk [vmem:[%s4371_s2 + $0x6e8] sm:$0xff] %vm1837_vm0, %v1830_v61  ;;  %2058 = vst.msk [vmem:[%s4371_s2 + $0x6e0] sm:$0xff] %vm1837_vm0, %v1829_v62 }
 0x239   :  { %v1587_v1 = vpop.permute.xlu1 %1586  ;;  %v1582_v2 = vpop.permute.xlu0 %1581 }
 0x23a   :  { %v1832_v3 = vmul.f32 %v1587_v1, %v464_v63  ;;  %v1831_v4 = vmul.f32 %v1582_v2, %v463_v0 }
 0x23c   :  { %2061 = vst.msk [vmem:[%s4371_s2 + $0x6f8] sm:$0xff] %vm1837_vm0, %v1832_v3  ;;  %2060 = vst.msk [vmem:[%s4371_s2 + $0x6f0] sm:$0xff] %vm1837_vm0, %v1831_v4 }
 0x23d   :  { %v1597_v7 = vpop.permute.xlu1 %1596  ;;  %v1592_v8 = vpop.permute.xlu0 %1591 }
 0x23e   :  { %v1834_v9 = vmul.f32 %v1597_v7, %v466_v5  ;;  %v1833_v10 = vmul.f32 %v1592_v8, %v465_v6 }
 0x240   :  { %2063 = vst.msk [vmem:[%s4371_s2 + $0x708] sm:$0xff] %vm1837_vm0, %v1834_v9  ;;  %2062 = vst.msk [vmem:[%s4371_s2 + $0x700] sm:$0xff] %vm1837_vm0, %v1833_v10 }
 0x241   :  { %v1607_v13 = vpop.permute.xlu1 %1606  ;;  %v1602_v14 = vpop.permute.xlu0 %1601 }
 0x242   :  { %v1836_v15 = vmul.f32 %v1607_v13, %v468_v11  ;;  %v1835_v16 = vmul.f32 %v1602_v14, %v467_v12 }
 0x244   :  { %2065 = vst.msk [vmem:[%s4371_s2 + $0x718] sm:$0xff] %vm1837_vm0, %v1836_v15  ;;  %2064 = vst.msk [vmem:[%s4371_s2 + $0x710] sm:$0xff] %vm1837_vm0, %v1835_v16 }

</bundles_post_ra>
